<compile_context>
chip_gen: v7x
topology: tpu7x:2x2x1
jax: 0.10.0
libtpu: 0.0.40
codegen_flags: <defaults>
</compile_context>

<pallas_src>
import math

import jax
import jax.numpy as jnp
from jax.experimental import pallas as pl
from jax.experimental.pallas import tpu as pltpu

# ---- small, module-consistent configuration ---------------------------------
B = 2           # batch_size
S = 8           # seq_len (number of sentence embeddings)
D = 32          # embedding_dim
H = 4           # num_heads   (D % H == 0, like 384/6)
L = 2           # num_layers
HD = D // H     # head_dim
FF = 4 * D      # dim_feedforward = embedding_dim * 4
D2 = D // 2     # boundary predictor hidden dim
PD = D2 + D     # fused (boundary|consistency) hidden width
G = B * H       # attention group axis (g = h*B + b inside the kernel)
BS = B * S      # flattened token axis
EPS = 1e-5      # nn.LayerNorm default eps

# ---- weight-slab row map (lane width 128, f32) -------------------------------
W_LANES = 128
R_QKV = 0                      # (D, 3D)  fused Wq|Wk|Wv (Q cols pre-scaled)
R_WO = D                       # (D, D)   attention output projection
R_WF1 = 2 * D                  # (D, FF)
R_WF2 = 3 * D                  # (FF, D)
RW_LAYER = 3 * D + FF          # 224 rows per encoder layer
R_WTOP = L * RW_LAYER          # (D, PD)  [bw1 | cw1a]
R_WBOT = R_WTOP + D            # (D, PD)  [ 0  | cw1b]
R_W2 = R_WBOT + D              # (PD, 2)  blockdiag(bw2, cw2)
RW_TOTAL = R_W2 + PD           # 560 rows

# ---- bias / vector slab row map ----------------------------------------------
RB_PE = 0                      # rows [0:BS): positional encoding, tiled over batch
RB_LAYER0 = BS                 # per-layer base; 8 rows per layer:
NB_LAYER = 8                   #   +0 b_qkv, +1 b_o, +2 b_f1, +3 b_f2, +4 n1w, +5 n1b, +6 n2w, +7 n2b
RB_B1 = RB_LAYER0 + L * NB_LAYER   # fused predictor bias 1: [bb1 | cb1]
RB_B2 = RB_B1 + 1                  # fused predictor bias 2: [bb2 | cb2]
RB_TOTAL = 40                      # padded to a sublane multiple


def _gelu(x):
    # TODO(synk): PyTorch nn.GELU defaults to exact erf; tanh approximation is used for
    # guaranteed TPU (EUP) lowering (|err| ~1e-3).
    return 0.5 * x * (1.0 + jnp.tanh(0.7978845608028654 * (x + 0.044715 * x * x * x)))


def segmenter_kernel(x_ref, w_ref, b_ref, out_ref):
    f32 = jnp.float32

    def ln(x, w, b):
        mu = jnp.mean(x, axis=-1, keepdims=True)
        var = jnp.mean((x - mu) ** 2, axis=-1, keepdims=True)
        return (x - mu) * jax.lax.rsqrt(var + EPS) * w + b

    # positional encoding (+ identity dropout, eval mode); hf is the (B*S, D) token slab
    hf = x_ref[...] + b_ref[RB_PE:RB_PE + BS, 0:D]                         # (BS, D)

    # ---- nn.TransformerEncoder, post-LN layers, activation='gelu' ------------
    for l in range(L):                                                     # static unroll
        wb = l * RW_LAYER
        rb = RB_LAYER0 + l * NB_LAYER

        # fused QKV projection: one (BS,D)@(D,3D) MXU pass; 1/sqrt(HD) folded into Q
        qkv = (jnp.dot(hf, w_ref[wb + R_QKV: wb + R_QKV + D, 0:3 * D],
                       preferred_element_type=f32)
               + b_ref[rb + 0: rb + 1, 0:3 * D])                           # (BS, 3D)

        # head split: 8-lane slices stacked on a leading group axis g = h*B + b
        q = jnp.concatenate(
            [qkv[:, h * HD:(h + 1) * HD].reshape(B, S, HD) for h in range(H)], axis=0)
        k = jnp.concatenate(
            [qkv[:, D + h * HD: D + (h + 1) * HD].reshape(B, S, HD) for h in range(H)],
            axis=0)                                                        # (G, S, HD)

        s = jnp.einsum('gse,gte->gst', q, k, preferred_element_type=f32)   # (G, S, S)
        s = s - jnp.max(s, axis=-1, keepdims=True)
        p = jnp.exp(s)
        p = p / jnp.sum(p, axis=-1, keepdims=True)                         # exact softmax

        v = jnp.concatenate(
            [qkv[:, 2 * D + h * HD: 2 * D + (h + 1) * HD].reshape(B, S, HD)
             for h in range(H)], axis=0)                                   # (G, S, HD)
        ctx = jnp.einsum('gst,gte->gse', p, v, preferred_element_type=f32) # (G, S, HD)

        # merge heads back onto the lane axis, then one flat output projection
        ctx = jnp.concatenate(
            [ctx[h * B:(h + 1) * B].reshape(BS, HD) for h in range(H)], axis=-1)
        attn = (jnp.dot(ctx, w_ref[wb + R_WO: wb + R_WO + D, 0:D],
                        preferred_element_type=f32)
                + b_ref[rb + 1: rb + 2, 0:D])
        hf = ln(hf + attn, b_ref[rb + 4: rb + 5, 0:D], b_ref[rb + 5: rb + 6, 0:D])

        # feed-forward block
        ff = _gelu(jnp.dot(hf, w_ref[wb + R_WF1: wb + R_WF1 + D, 0:FF],
                           preferred_element_type=f32)
                   + b_ref[rb + 2: rb + 3, 0:FF])
        ff = (jnp.dot(ff, w_ref[wb + R_WF2: wb + R_WF2 + FF, 0:D],
                      preferred_element_type=f32)
              + b_ref[rb + 3: rb + 4, 0:D])
        hf = ln(hf + ff, b_ref[rb + 6: rb + 7, 0:D], b_ref[rb + 7: rb + 8, 0:D])

    out_ref[:, 0:D] = hf.astype(out_ref.dtype)                             # encoded tokens

    # ---- fused boundary + consistency predictor heads -------------------------
    # hnext[r] = hf[r + 1 (mod BS)]; the batch-boundary wrap rows are trimmed in the wrapper.
    hnext = pltpu.roll(hf, shift=BS - 1, axis=0)    # == jnp.roll(hf, -1, axis=0)
    hid = (jnp.dot(hf, w_ref[R_WTOP: R_WTOP + D, 0:PD], preferred_element_type=f32)
           + jnp.dot(hnext, w_ref[R_WBOT: R_WBOT + D, 0:PD], preferred_element_type=f32)
           + b_ref[RB_B1: RB_B1 + 1, 0:PD])                                 # (BS, PD)
    pred = (jnp.dot(_gelu(hid), w_ref[R_W2: R_W2 + PD, 0:2],
                    preferred_element_type=f32)
            + b_ref[RB_B2: RB_B2 + 1, 0:2])                                 # (BS, 2)
    out_ref[:, D:D + 2] = jax.nn.sigmoid(pred).astype(out_ref.dtype)


def make_positional_encoding(seq_len, d_model):
    position = jnp.arange(seq_len, dtype=jnp.float32)[:, None]
    div_term = jnp.exp(jnp.arange(0, d_model, 2, dtype=jnp.float32)
                       * (-math.log(10000.0) / d_model))
    pe = jnp.zeros((seq_len, d_model), jnp.float32)
    pe = pe.at[:, 0::2].set(jnp.sin(position * div_term))
    pe = pe.at[:, 1::2].set(jnp.cos(position * div_term))
    return pe


def init_params(key):
    """Deterministic synthetic parameters.  Linear weights stored as (in, out)."""
    ks = jax.random.split(key, 16)
    sdev = 0.05
    n = lambda k, shape: jax.random.normal(k, shape, jnp.float32) * sdev
    return {
        # per-layer (stacked along leading L axis) transformer encoder params
        "wqkv": n(ks[0], (L, D, 3 * D)), "bqkv": n(ks[1], (L, 1, 3 * D)),
        "wo":   n(ks[2], (L, D, D)),     "bo":   n(ks[3], (L, 1, D)),
        "wf1":  n(ks[4], (L, D, FF)),    "bf1":  n(ks[5], (L, 1, FF)),
        "wf2":  n(ks[6], (L, FF, D)),    "bf2":  n(ks[7], (L, 1, D)),
        "n1w":  jnp.ones((L, 1, D), jnp.float32), "n1b": jnp.zeros((L, 1, D), jnp.float32),
        "n2w":  jnp.ones((L, 1, D), jnp.float32), "n2b": jnp.zeros((L, 1, D), jnp.float32),
        # boundary predictor: Linear(D, D/2) -> GELU -> Linear(D/2, 1) -> Sigmoid
        "bw1": n(ks[8], (D, D2)),  "bb1": n(ks[9], (1, D2)),
        "bw2": n(ks[10], (D2, 1)), "bb2": n(ks[11], (1, 1)),
        # consistency predictor: Linear(2D, D) -> GELU -> Linear(D, 1) -> Sigmoid
        "cw1": n(ks[12], (2 * D, D)), "cb1": n(ks[13], (1, D)),
        "cw2": n(ks[14], (D, 1)),     "cb2": n(ks[15], (1, 1)),
    }


def _pack_params(p, pe_f):
    """Host-side packing into two lane-dense slabs; q-scale folded, predictors fused."""
    scale = 1.0 / math.sqrt(HD)
    qscale = jnp.concatenate([jnp.full((D,), scale, jnp.float32),
                              jnp.ones((2 * D,), jnp.float32)])             # per-column

    w = jnp.zeros((RW_TOTAL, W_LANES), jnp.float32)
    bv = jnp.zeros((RB_TOTAL, W_LANES), jnp.float32)

    bv = bv.at[RB_PE:RB_PE + BS, 0:D].set(pe_f)

    for l in range(L):
        base = l * RW_LAYER
        rb = RB_LAYER0 + l * NB_LAYER
        w = w.at[base + R_QKV: base + R_QKV + D, 0:3 * D].set(p["wqkv"][l] * qscale[None, :])
        w = w.at[base + R_WO:  base + R_WO + D,  0:D].set(p["wo"][l])
        w = w.at[base + R_WF1: base + R_WF1 + D, 0:FF].set(p["wf1"][l])
        w = w.at[base + R_WF2: base + R_WF2 + FF, 0:D].set(p["wf2"][l])
        bv = bv.at[rb + 0, 0:3 * D].set(p["bqkv"][l, 0] * qscale)
        bv = bv.at[rb + 1, 0:D].set(p["bo"][l, 0])
        bv = bv.at[rb + 2, 0:FF].set(p["bf1"][l, 0])
        bv = bv.at[rb + 3, 0:D].set(p["bf2"][l, 0])
        bv = bv.at[rb + 4, 0:D].set(p["n1w"][l, 0])
        bv = bv.at[rb + 5, 0:D].set(p["n1b"][l, 0])
        bv = bv.at[rb + 6, 0:D].set(p["n2w"][l, 0])
        bv = bv.at[rb + 7, 0:D].set(p["n2b"][l, 0])

    # fused predictor heads: W_top=[bw1|cw1a], W_bot=[0|cw1b], W2=blockdiag(bw2,cw2)
    cw1a, cw1b = p["cw1"][:D], p["cw1"][D:]
    w = w.at[R_WTOP:R_WTOP + D, 0:D2].set(p["bw1"])
    w = w.at[R_WTOP:R_WTOP + D, D2:PD].set(cw1a)
    w = w.at[R_WBOT:R_WBOT + D, D2:PD].set(cw1b)
    w = w.at[R_W2:R_W2 + D2, 0:1].set(p["bw2"])
    w = w.at[R_W2 + D2:R_W2 + PD, 1:2].set(p["cw2"])
    bv = bv.at[RB_B1, 0:D2].set(p["bb1"][0])
    bv = bv.at[RB_B1, D2:PD].set(p["cb1"][0])
    bv = bv.at[RB_B2, 0:1].set(p["bb2"][0])
    bv = bv.at[RB_B2, 1:2].set(p["cb2"][0])
    return w, bv


def segmentation_transformer_forward(sentence_embeddings, params):
    """sentence_embeddings: (B, S, D) float32; attention_mask=None path only."""
    pe_f = jnp.tile(make_positional_encoding(S, D), (B, 1))                 # (BS, D)
    w_slab, b_slab = _pack_params(params, pe_f)
    x_f = sentence_embeddings.reshape(BS, D)

    vmem = pl.BlockSpec(memory_space=pltpu.MemorySpace.VMEM)                # whole array
    out = pl.pallas_call(
        segmenter_kernel,
        out_shape=jax.ShapeDtypeStruct((BS, D + 2), jnp.float32),           # enc | preds
        in_specs=[vmem, vmem, vmem],
        out_specs=vmem,
    )(x_f, w_slab, b_slab)

    enc = out[:, 0:D].reshape(B, S, D)
    pred = out[:, D:D + 2].reshape(B, S, 2)
    return {
        "encoded_sentences": enc,                       # (B, S, D)
        "boundary_predictions": pred[:, :S - 1, 0],     # (B, S-1)
        "consistency_predictions": pred[:, :S - 1, 1],  # (B, S-1)
    }


if __name__ == "__main__":
    key = jax.random.PRNGKey(0)
    kx, kp = jax.random.split(key)
    sentence_embeddings = jax.random.normal(kx, (B, S, D), jnp.float32)
    params = init_params(kp)

    fwd = jax.jit(segmentation_transformer_forward)
    out = fwd(sentence_embeddings, params)
    out = jax.tree_util.tree_map(jax.block_until_ready, out)

    assert out["encoded_sentences"].shape == (B, S, D)
    assert out["boundary_predictions"].shape == (B, S - 1)
    assert out["consistency_predictions"].shape == (B, S - 1)
    for v in out.values():
        assert bool(jnp.all(jnp.isfinite(v)))
    print("KERNEL_OK")
</pallas_src>

<mosaic_0001>
module attributes {stable_mosaic.version = 11 : i64} {
  func.func @segmenter_kernel(%arg0: memref<16x32xf32, #tpu.memory_space<vmem>>, %arg1: memref<560x128xf32, #tpu.memory_space<vmem>>, %arg2: memref<40x128xf32, #tpu.memory_space<vmem>>, %arg3: memref<16x34xf32, #tpu.memory_space<vmem>>) attributes {dimension_semantics = [], scalar_prefetch = 0 : i64, scratch_operands = 0 : i64, tpu.core_type = #tpu.core_type<tc>} {
    %c0 = arith.constant 0 : index
    %c0_0 = arith.constant 0 : index
    %0 = vector.load %arg0[%c0, %c0_0] : memref<16x32xf32, #tpu.memory_space<vmem>>, vector<16x32xf32>
    %c0_1 = arith.constant 0 : index
    %c0_2 = arith.constant 0 : index
    %1 = vector.load %arg2[%c0_1, %c0_2] : memref<40x128xf32, #tpu.memory_space<vmem>>, vector<16x32xf32>
    %2 = arith.addf %0, %1 : vector<16x32xf32>
    %c0_3 = arith.constant 0 : index
    %c0_4 = arith.constant 0 : index
    %3 = vector.load %arg1[%c0_3, %c0_4] : memref<560x128xf32, #tpu.memory_space<vmem>>, vector<32x96xf32>
    %cst = arith.constant dense<0.000000e+00> : vector<16x96xf32>
    %4 = tpu.matmul %2, %3, %cst {dimension_numbers = #tpu.dot_dimension_numbers<[1], [0], [0], [1], [0, 0, 1, 1], [], []>} : vector<16x32xf32>, vector<32x96xf32>, vector<16x96xf32> -> vector<16x96xf32>
    %c16 = arith.constant 16 : index
    %c0_5 = arith.constant 0 : index
    %5 = vector.load %arg2[%c16, %c0_5] : memref<40x128xf32, #tpu.memory_space<vmem>>, vector<1x96xf32>
    %6 = vector.broadcast %5 : vector<1x96xf32> to vector<16x96xf32>
    %7 = arith.addf %4, %6 : vector<16x96xf32>
    %8 = vector.extract_strided_slice %7 {offsets = [0, 0], sizes = [16, 8], strides = [1, 1]} : vector<16x96xf32> to vector<16x8xf32>
    %9 = vector.shape_cast %8 : vector<16x8xf32> to vector<2x8x8xf32>
    %10 = vector.extract_strided_slice %7 {offsets = [0, 8], sizes = [16, 8], strides = [1, 1]} : vector<16x96xf32> to vector<16x8xf32>
    %11 = vector.shape_cast %10 : vector<16x8xf32> to vector<2x8x8xf32>
    %12 = vector.extract_strided_slice %7 {offsets = [0, 16], sizes = [16, 8], strides = [1, 1]} : vector<16x96xf32> to vector<16x8xf32>
    %13 = vector.shape_cast %12 : vector<16x8xf32> to vector<2x8x8xf32>
    %14 = vector.extract_strided_slice %7 {offsets = [0, 24], sizes = [16, 8], strides = [1, 1]} : vector<16x96xf32> to vector<16x8xf32>
    %15 = vector.shape_cast %14 : vector<16x8xf32> to vector<2x8x8xf32>
    %16 = tpu.concatenate %9, %11, %13, %15 in 0 : vector<2x8x8xf32>, vector<2x8x8xf32>, vector<2x8x8xf32>, vector<2x8x8xf32> -> vector<8x8x8xf32>
    %17 = vector.extract_strided_slice %7 {offsets = [0, 32], sizes = [16, 8], strides = [1, 1]} : vector<16x96xf32> to vector<16x8xf32>
    %18 = vector.shape_cast %17 : vector<16x8xf32> to vector<2x8x8xf32>
    %19 = vector.extract_strided_slice %7 {offsets = [0, 40], sizes = [16, 8], strides = [1, 1]} : vector<16x96xf32> to vector<16x8xf32>
    %20 = vector.shape_cast %19 : vector<16x8xf32> to vector<2x8x8xf32>
    %21 = vector.extract_strided_slice %7 {offsets = [0, 48], sizes = [16, 8], strides = [1, 1]} : vector<16x96xf32> to vector<16x8xf32>
    %22 = vector.shape_cast %21 : vector<16x8xf32> to vector<2x8x8xf32>
    %23 = vector.extract_strided_slice %7 {offsets = [0, 56], sizes = [16, 8], strides = [1, 1]} : vector<16x96xf32> to vector<16x8xf32>
    %24 = vector.shape_cast %23 : vector<16x8xf32> to vector<2x8x8xf32>
    %25 = tpu.concatenate %18, %20, %22, %24 in 0 : vector<2x8x8xf32>, vector<2x8x8xf32>, vector<2x8x8xf32>, vector<2x8x8xf32> -> vector<8x8x8xf32>
    "tpu.trace_start"() <{level = 10 : i32, message = "gse,gte->gst"}> : () -> ()
    %cst_6 = arith.constant dense<0.000000e+00> : vector<8x8x8xf32>
    %26 = tpu.matmul %16, %25, %cst_6 {dimension_numbers = #tpu.dot_dimension_numbers<[2], [2], [1], [1], [0, 0, 0, 1, 1, 1], [0], [0]>} : vector<8x8x8xf32>, vector<8x8x8xf32>, vector<8x8x8xf32> -> vector<8x8x8xf32>
    "tpu.trace_stop"() : () -> ()
    %cst_7 = arith.constant dense<0xFF800000> : vector<8x8xf32>
    %27 = vector.multi_reduction <maximumf>, %26, %cst_7 [2] : vector<8x8x8xf32> to vector<8x8xf32>
    %28 = vector.shape_cast %27 : vector<8x8xf32> to vector<8x8x1xf32>
    %29 = vector.broadcast %28 : vector<8x8x1xf32> to vector<8x8x8xf32>
    %30 = arith.subf %26, %29 : vector<8x8x8xf32>
    %31 = math.exp %30 : vector<8x8x8xf32>
    %cst_8 = arith.constant dense<0.000000e+00> : vector<8x8xf32>
    %32 = vector.multi_reduction <add>, %31, %cst_8 [2] : vector<8x8x8xf32> to vector<8x8xf32>
    %33 = vector.shape_cast %32 : vector<8x8xf32> to vector<8x8x1xf32>
    %34 = vector.broadcast %33 : vector<8x8x1xf32> to vector<8x8x8xf32>
    %35 = arith.divf %31, %34 : vector<8x8x8xf32>
    %36 = vector.extract_strided_slice %7 {offsets = [0, 64], sizes = [16, 8], strides = [1, 1]} : vector<16x96xf32> to vector<16x8xf32>
    %37 = vector.shape_cast %36 : vector<16x8xf32> to vector<2x8x8xf32>
    %38 = vector.extract_strided_slice %7 {offsets = [0, 72], sizes = [16, 8], strides = [1, 1]} : vector<16x96xf32> to vector<16x8xf32>
    %39 = vector.shape_cast %38 : vector<16x8xf32> to vector<2x8x8xf32>
    %40 = vector.extract_strided_slice %7 {offsets = [0, 80], sizes = [16, 8], strides = [1, 1]} : vector<16x96xf32> to vector<16x8xf32>
    %41 = vector.shape_cast %40 : vector<16x8xf32> to vector<2x8x8xf32>
    %42 = vector.extract_strided_slice %7 {offsets = [0, 88], sizes = [16, 8], strides = [1, 1]} : vector<16x96xf32> to vector<16x8xf32>
    %43 = vector.shape_cast %42 : vector<16x8xf32> to vector<2x8x8xf32>
    %44 = tpu.concatenate %37, %39, %41, %43 in 0 : vector<2x8x8xf32>, vector<2x8x8xf32>, vector<2x8x8xf32>, vector<2x8x8xf32> -> vector<8x8x8xf32>
    "tpu.trace_start"() <{level = 10 : i32, message = "gst,gte->gse"}> : () -> ()
    %cst_9 = arith.constant dense<0.000000e+00> : vector<8x8x8xf32>
    %45 = tpu.matmul %35, %44, %cst_9 {dimension_numbers = #tpu.dot_dimension_numbers<[2], [1], [1], [2], [0, 0, 0, 1, 1, 2], [0], [0]>} : vector<8x8x8xf32>, vector<8x8x8xf32>, vector<8x8x8xf32> -> vector<8x8x8xf32>
    "tpu.trace_stop"() : () -> ()
    %46 = vector.extract_strided_slice %45 {offsets = [0, 0, 0], sizes = [2, 8, 8], strides = [1, 1, 1]} : vector<8x8x8xf32> to vector<2x8x8xf32>
    %47 = vector.shape_cast %46 : vector<2x8x8xf32> to vector<16x8xf32>
    %48 = vector.extract_strided_slice %45 {offsets = [2, 0, 0], sizes = [2, 8, 8], strides = [1, 1, 1]} : vector<8x8x8xf32> to vector<2x8x8xf32>
    %49 = vector.shape_cast %48 : vector<2x8x8xf32> to vector<16x8xf32>
    %50 = vector.extract_strided_slice %45 {offsets = [4, 0, 0], sizes = [2, 8, 8], strides = [1, 1, 1]} : vector<8x8x8xf32> to vector<2x8x8xf32>
    %51 = vector.shape_cast %50 : vector<2x8x8xf32> to vector<16x8xf32>
    %52 = vector.extract_strided_slice %45 {offsets = [6, 0, 0], sizes = [2, 8, 8], strides = [1, 1, 1]} : vector<8x8x8xf32> to vector<2x8x8xf32>
    %53 = vector.shape_cast %52 : vector<2x8x8xf32> to vector<16x8xf32>
    %54 = tpu.concatenate %47, %49, %51, %53 in 1 : vector<16x8xf32>, vector<16x8xf32>, vector<16x8xf32>, vector<16x8xf32> -> vector<16x32xf32>
    %c32 = arith.constant 32 : index
    %c0_10 = arith.constant 0 : index
    %55 = vector.load %arg1[%c32, %c0_10] : memref<560x128xf32, #tpu.memory_space<vmem>>, vector<32x32xf32>
    %cst_11 = arith.constant dense<0.000000e+00> : vector<16x32xf32>
    %56 = tpu.matmul %54, %55, %cst_11 {dimension_numbers = #tpu.dot_dimension_numbers<[1], [0], [0], [1], [0, 0, 1, 1], [], []>} : vector<16x32xf32>, vector<32x32xf32>, vector<16x32xf32> -> vector<16x32xf32>
    %c17 = arith.constant 17 : index
    %c0_12 = arith.constant 0 : index
    %57 = vector.load %arg2[%c17, %c0_12] : memref<40x128xf32, #tpu.memory_space<vmem>>, vector<1x32xf32>
    %58 = vector.broadcast %57 : vector<1x32xf32> to vector<16x32xf32>
    %59 = arith.addf %56, %58 : vector<16x32xf32>
    %60 = arith.addf %2, %59 : vector<16x32xf32>
    %c20 = arith.constant 20 : index
    %c0_13 = arith.constant 0 : index
    %61 = vector.load %arg2[%c20, %c0_13] : memref<40x128xf32, #tpu.memory_space<vmem>>, vector<1x32xf32>
    %c21 = arith.constant 21 : index
    %c0_14 = arith.constant 0 : index
    %62 = vector.load %arg2[%c21, %c0_14] : memref<40x128xf32, #tpu.memory_space<vmem>>, vector<1x32xf32>
    %cst_15 = arith.constant dense<0.000000e+00> : vector<16xf32>
    %63 = vector.multi_reduction <add>, %60, %cst_15 [1] : vector<16x32xf32> to vector<16xf32>
    %64 = vector.shape_cast %63 : vector<16xf32> to vector<16x1xf32>
    %cst_16 = arith.constant 3.200000e+01 : f32
    %65 = vector.broadcast %cst_16 : f32 to vector<16x1xf32>
    %66 = arith.divf %64, %65 : vector<16x1xf32>
    %67 = vector.broadcast %66 : vector<16x1xf32> to vector<16x32xf32>
    %68 = arith.subf %60, %67 : vector<16x32xf32>
    %69 = arith.mulf %68, %68 : vector<16x32xf32>
    %cst_17 = arith.constant dense<0.000000e+00> : vector<16xf32>
    %70 = vector.multi_reduction <add>, %69, %cst_17 [1] : vector<16x32xf32> to vector<16xf32>
    %71 = vector.shape_cast %70 : vector<16xf32> to vector<16x1xf32>
    %cst_18 = arith.constant 3.200000e+01 : f32
    %72 = vector.broadcast %cst_18 : f32 to vector<16x1xf32>
    %73 = arith.divf %71, %72 : vector<16x1xf32>
    %74 = vector.broadcast %66 : vector<16x1xf32> to vector<16x32xf32>
    %75 = arith.subf %60, %74 : vector<16x32xf32>
    %cst_19 = arith.constant 9.99999974E-6 : f32
    %76 = vector.broadcast %cst_19 : f32 to vector<16x1xf32>
    %77 = arith.addf %73, %76 : vector<16x1xf32>
    %78 = math.rsqrt %77 : vector<16x1xf32>
    %79 = vector.broadcast %78 : vector<16x1xf32> to vector<16x32xf32>
    %80 = arith.mulf %75, %79 : vector<16x32xf32>
    %81 = vector.broadcast %61 : vector<1x32xf32> to vector<16x32xf32>
    %82 = arith.mulf %80, %81 : vector<16x32xf32>
    %83 = vector.broadcast %62 : vector<1x32xf32> to vector<16x32xf32>
    %84 = arith.addf %82, %83 : vector<16x32xf32>
    %c64 = arith.constant 64 : index
    %c0_20 = arith.constant 0 : index
    %85 = vector.load %arg1[%c64, %c0_20] : memref<560x128xf32, #tpu.memory_space<vmem>>, vector<32x128xf32>
    %cst_21 = arith.constant dense<0.000000e+00> : vector<16x128xf32>
    %86 = tpu.matmul %84, %85, %cst_21 {dimension_numbers = #tpu.dot_dimension_numbers<[1], [0], [0], [1], [0, 0, 1, 1], [], []>} : vector<16x32xf32>, vector<32x128xf32>, vector<16x128xf32> -> vector<16x128xf32>
    %c18 = arith.constant 18 : index
    %c0_22 = arith.constant 0 : index
    %87 = vector.load %arg2[%c18, %c0_22] : memref<40x128xf32, #tpu.memory_space<vmem>>, vector<1x128xf32>
    %88 = vector.broadcast %87 : vector<1x128xf32> to vector<16x128xf32>
    %89 = arith.addf %86, %88 : vector<16x128xf32>
    %cst_23 = arith.constant 5.000000e-01 : f32
    %90 = vector.broadcast %cst_23 : f32 to vector<16x128xf32>
    %91 = arith.mulf %90, %89 : vector<16x128xf32>
    %cst_24 = arith.constant 4.471500e-02 : f32
    %92 = vector.broadcast %cst_24 : f32 to vector<16x128xf32>
    %93 = arith.mulf %92, %89 : vector<16x128xf32>
    %94 = arith.mulf %93, %89 : vector<16x128xf32>
    %95 = arith.mulf %94, %89 : vector<16x128xf32>
    %96 = arith.addf %89, %95 : vector<16x128xf32>
    %cst_25 = arith.constant 0.797884583 : f32
    %97 = vector.broadcast %cst_25 : f32 to vector<16x128xf32>
    %98 = arith.mulf %97, %96 : vector<16x128xf32>
    %99 = math.tanh %98 : vector<16x128xf32>
    %cst_26 = arith.constant 1.000000e+00 : f32
    %100 = vector.broadcast %cst_26 : f32 to vector<16x128xf32>
    %101 = arith.addf %100, %99 : vector<16x128xf32>
    %102 = arith.mulf %91, %101 : vector<16x128xf32>
    %c96 = arith.constant 96 : index
    %c0_27 = arith.constant 0 : index
    %103 = vector.load %arg1[%c96, %c0_27] : memref<560x128xf32, #tpu.memory_space<vmem>>, vector<128x32xf32>
    %cst_28 = arith.constant dense<0.000000e+00> : vector<16x32xf32>
    %104 = tpu.matmul %102, %103, %cst_28 {dimension_numbers = #tpu.dot_dimension_numbers<[1], [0], [0], [1], [0, 0, 1, 1], [], []>} : vector<16x128xf32>, vector<128x32xf32>, vector<16x32xf32> -> vector<16x32xf32>
    %c19 = arith.constant 19 : index
    %c0_29 = arith.constant 0 : index
    %105 = vector.load %arg2[%c19, %c0_29] : memref<40x128xf32, #tpu.memory_space<vmem>>, vector<1x32xf32>
    %106 = vector.broadcast %105 : vector<1x32xf32> to vector<16x32xf32>
    %107 = arith.addf %104, %106 : vector<16x32xf32>
    %108 = arith.addf %84, %107 : vector<16x32xf32>
    %c22 = arith.constant 22 : index
    %c0_30 = arith.constant 0 : index
    %109 = vector.load %arg2[%c22, %c0_30] : memref<40x128xf32, #tpu.memory_space<vmem>>, vector<1x32xf32>
    %c23 = arith.constant 23 : index
    %c0_31 = arith.constant 0 : index
    %110 = vector.load %arg2[%c23, %c0_31] : memref<40x128xf32, #tpu.memory_space<vmem>>, vector<1x32xf32>
    %cst_32 = arith.constant dense<0.000000e+00> : vector<16xf32>
    %111 = vector.multi_reduction <add>, %108, %cst_32 [1] : vector<16x32xf32> to vector<16xf32>
    %112 = vector.shape_cast %111 : vector<16xf32> to vector<16x1xf32>
    %cst_33 = arith.constant 3.200000e+01 : f32
    %113 = vector.broadcast %cst_33 : f32 to vector<16x1xf32>
    %114 = arith.divf %112, %113 : vector<16x1xf32>
    %115 = vector.broadcast %114 : vector<16x1xf32> to vector<16x32xf32>
    %116 = arith.subf %108, %115 : vector<16x32xf32>
    %117 = arith.mulf %116, %116 : vector<16x32xf32>
    %cst_34 = arith.constant dense<0.000000e+00> : vector<16xf32>
    %118 = vector.multi_reduction <add>, %117, %cst_34 [1] : vector<16x32xf32> to vector<16xf32>
    %119 = vector.shape_cast %118 : vector<16xf32> to vector<16x1xf32>
    %cst_35 = arith.constant 3.200000e+01 : f32
    %120 = vector.broadcast %cst_35 : f32 to vector<16x1xf32>
    %121 = arith.divf %119, %120 : vector<16x1xf32>
    %122 = vector.broadcast %114 : vector<16x1xf32> to vector<16x32xf32>
    %123 = arith.subf %108, %122 : vector<16x32xf32>
    %cst_36 = arith.constant 9.99999974E-6 : f32
    %124 = vector.broadcast %cst_36 : f32 to vector<16x1xf32>
    %125 = arith.addf %121, %124 : vector<16x1xf32>
    %126 = math.rsqrt %125 : vector<16x1xf32>
    %127 = vector.broadcast %126 : vector<16x1xf32> to vector<16x32xf32>
    %128 = arith.mulf %123, %127 : vector<16x32xf32>
    %129 = vector.broadcast %109 : vector<1x32xf32> to vector<16x32xf32>
    %130 = arith.mulf %128, %129 : vector<16x32xf32>
    %131 = vector.broadcast %110 : vector<1x32xf32> to vector<16x32xf32>
    %132 = arith.addf %130, %131 : vector<16x32xf32>
    %c224 = arith.constant 224 : index
    %c0_37 = arith.constant 0 : index
    %133 = vector.load %arg1[%c224, %c0_37] : memref<560x128xf32, #tpu.memory_space<vmem>>, vector<32x96xf32>
    %cst_38 = arith.constant dense<0.000000e+00> : vector<16x96xf32>
    %134 = tpu.matmul %132, %133, %cst_38 {dimension_numbers = #tpu.dot_dimension_numbers<[1], [0], [0], [1], [0, 0, 1, 1], [], []>} : vector<16x32xf32>, vector<32x96xf32>, vector<16x96xf32> -> vector<16x96xf32>
    %c24 = arith.constant 24 : index
    %c0_39 = arith.constant 0 : index
    %135 = vector.load %arg2[%c24, %c0_39] : memref<40x128xf32, #tpu.memory_space<vmem>>, vector<1x96xf32>
    %136 = vector.broadcast %135 : vector<1x96xf32> to vector<16x96xf32>
    %137 = arith.addf %134, %136 : vector<16x96xf32>
    %138 = vector.extract_strided_slice %137 {offsets = [0, 0], sizes = [16, 8], strides = [1, 1]} : vector<16x96xf32> to vector<16x8xf32>
    %139 = vector.shape_cast %138 : vector<16x8xf32> to vector<2x8x8xf32>
    %140 = vector.extract_strided_slice %137 {offsets = [0, 8], sizes = [16, 8], strides = [1, 1]} : vector<16x96xf32> to vector<16x8xf32>
    %141 = vector.shape_cast %140 : vector<16x8xf32> to vector<2x8x8xf32>
    %142 = vector.extract_strided_slice %137 {offsets = [0, 16], sizes = [16, 8], strides = [1, 1]} : vector<16x96xf32> to vector<16x8xf32>
    %143 = vector.shape_cast %142 : vector<16x8xf32> to vector<2x8x8xf32>
    %144 = vector.extract_strided_slice %137 {offsets = [0, 24], sizes = [16, 8], strides = [1, 1]} : vector<16x96xf32> to vector<16x8xf32>
    %145 = vector.shape_cast %144 : vector<16x8xf32> to vector<2x8x8xf32>
    %146 = tpu.concatenate %139, %141, %143, %145 in 0 : vector<2x8x8xf32>, vector<2x8x8xf32>, vector<2x8x8xf32>, vector<2x8x8xf32> -> vector<8x8x8xf32>
    %147 = vector.extract_strided_slice %137 {offsets = [0, 32], sizes = [16, 8], strides = [1, 1]} : vector<16x96xf32> to vector<16x8xf32>
    %148 = vector.shape_cast %147 : vector<16x8xf32> to vector<2x8x8xf32>
    %149 = vector.extract_strided_slice %137 {offsets = [0, 40], sizes = [16, 8], strides = [1, 1]} : vector<16x96xf32> to vector<16x8xf32>
    %150 = vector.shape_cast %149 : vector<16x8xf32> to vector<2x8x8xf32>
    %151 = vector.extract_strided_slice %137 {offsets = [0, 48], sizes = [16, 8], strides = [1, 1]} : vector<16x96xf32> to vector<16x8xf32>
    %152 = vector.shape_cast %151 : vector<16x8xf32> to vector<2x8x8xf32>
    %153 = vector.extract_strided_slice %137 {offsets = [0, 56], sizes = [16, 8], strides = [1, 1]} : vector<16x96xf32> to vector<16x8xf32>
    %154 = vector.shape_cast %153 : vector<16x8xf32> to vector<2x8x8xf32>
    %155 = tpu.concatenate %148, %150, %152, %154 in 0 : vector<2x8x8xf32>, vector<2x8x8xf32>, vector<2x8x8xf32>, vector<2x8x8xf32> -> vector<8x8x8xf32>
    "tpu.trace_start"() <{level = 10 : i32, message = "gse,gte->gst"}> : () -> ()
    %cst_40 = arith.constant dense<0.000000e+00> : vector<8x8x8xf32>
    %156 = tpu.matmul %146, %155, %cst_40 {dimension_numbers = #tpu.dot_dimension_numbers<[2], [2], [1], [1], [0, 0, 0, 1, 1, 1], [0], [0]>} : vector<8x8x8xf32>, vector<8x8x8xf32>, vector<8x8x8xf32> -> vector<8x8x8xf32>
    "tpu.trace_stop"() : () -> ()
    %cst_41 = arith.constant dense<0xFF800000> : vector<8x8xf32>
    %157 = vector.multi_reduction <maximumf>, %156, %cst_41 [2] : vector<8x8x8xf32> to vector<8x8xf32>
    %158 = vector.shape_cast %157 : vector<8x8xf32> to vector<8x8x1xf32>
    %159 = vector.broadcast %158 : vector<8x8x1xf32> to vector<8x8x8xf32>
    %160 = arith.subf %156, %159 : vector<8x8x8xf32>
    %161 = math.exp %160 : vector<8x8x8xf32>
    %cst_42 = arith.constant dense<0.000000e+00> : vector<8x8xf32>
    %162 = vector.multi_reduction <add>, %161, %cst_42 [2] : vector<8x8x8xf32> to vector<8x8xf32>
    %163 = vector.shape_cast %162 : vector<8x8xf32> to vector<8x8x1xf32>
    %164 = vector.broadcast %163 : vector<8x8x1xf32> to vector<8x8x8xf32>
    %165 = arith.divf %161, %164 : vector<8x8x8xf32>
    %166 = vector.extract_strided_slice %137 {offsets = [0, 64], sizes = [16, 8], strides = [1, 1]} : vector<16x96xf32> to vector<16x8xf32>
    %167 = vector.shape_cast %166 : vector<16x8xf32> to vector<2x8x8xf32>
    %168 = vector.extract_strided_slice %137 {offsets = [0, 72], sizes = [16, 8], strides = [1, 1]} : vector<16x96xf32> to vector<16x8xf32>
    %169 = vector.shape_cast %168 : vector<16x8xf32> to vector<2x8x8xf32>
    %170 = vector.extract_strided_slice %137 {offsets = [0, 80], sizes = [16, 8], strides = [1, 1]} : vector<16x96xf32> to vector<16x8xf32>
    %171 = vector.shape_cast %170 : vector<16x8xf32> to vector<2x8x8xf32>
    %172 = vector.extract_strided_slice %137 {offsets = [0, 88], sizes = [16, 8], strides = [1, 1]} : vector<16x96xf32> to vector<16x8xf32>
    %173 = vector.shape_cast %172 : vector<16x8xf32> to vector<2x8x8xf32>
    %174 = tpu.concatenate %167, %169, %171, %173 in 0 : vector<2x8x8xf32>, vector<2x8x8xf32>, vector<2x8x8xf32>, vector<2x8x8xf32> -> vector<8x8x8xf32>
    "tpu.trace_start"() <{level = 10 : i32, message = "gst,gte->gse"}> : () -> ()
    %cst_43 = arith.constant dense<0.000000e+00> : vector<8x8x8xf32>
    %175 = tpu.matmul %165, %174, %cst_43 {dimension_numbers = #tpu.dot_dimension_numbers<[2], [1], [1], [2], [0, 0, 0, 1, 1, 2], [0], [0]>} : vector<8x8x8xf32>, vector<8x8x8xf32>, vector<8x8x8xf32> -> vector<8x8x8xf32>
    "tpu.trace_stop"() : () -> ()
    %176 = vector.extract_strided_slice %175 {offsets = [0, 0, 0], sizes = [2, 8, 8], strides = [1, 1, 1]} : vector<8x8x8xf32> to vector<2x8x8xf32>
    %177 = vector.shape_cast %176 : vector<2x8x8xf32> to vector<16x8xf32>
    %178 = vector.extract_strided_slice %175 {offsets = [2, 0, 0], sizes = [2, 8, 8], strides = [1, 1, 1]} : vector<8x8x8xf32> to vector<2x8x8xf32>
    %179 = vector.shape_cast %178 : vector<2x8x8xf32> to vector<16x8xf32>
    %180 = vector.extract_strided_slice %175 {offsets = [4, 0, 0], sizes = [2, 8, 8], strides = [1, 1, 1]} : vector<8x8x8xf32> to vector<2x8x8xf32>
    %181 = vector.shape_cast %180 : vector<2x8x8xf32> to vector<16x8xf32>
    %182 = vector.extract_strided_slice %175 {offsets = [6, 0, 0], sizes = [2, 8, 8], strides = [1, 1, 1]} : vector<8x8x8xf32> to vector<2x8x8xf32>
    %183 = vector.shape_cast %182 : vector<2x8x8xf32> to vector<16x8xf32>
    %184 = tpu.concatenate %177, %179, %181, %183 in 1 : vector<16x8xf32>, vector<16x8xf32>, vector<16x8xf32>, vector<16x8xf32> -> vector<16x32xf32>
    %c256 = arith.constant 256 : index
    %c0_44 = arith.constant 0 : index
    %185 = vector.load %arg1[%c256, %c0_44] : memref<560x128xf32, #tpu.memory_space<vmem>>, vector<32x32xf32>
    %cst_45 = arith.constant dense<0.000000e+00> : vector<16x32xf32>
    %186 = tpu.matmul %184, %185, %cst_45 {dimension_numbers = #tpu.dot_dimension_numbers<[1], [0], [0], [1], [0, 0, 1, 1], [], []>} : vector<16x32xf32>, vector<32x32xf32>, vector<16x32xf32> -> vector<16x32xf32>
    %c25 = arith.constant 25 : index
    %c0_46 = arith.constant 0 : index
    %187 = vector.load %arg2[%c25, %c0_46] : memref<40x128xf32, #tpu.memory_space<vmem>>, vector<1x32xf32>
    %188 = vector.broadcast %187 : vector<1x32xf32> to vector<16x32xf32>
    %189 = arith.addf %186, %188 : vector<16x32xf32>
    %190 = arith.addf %132, %189 : vector<16x32xf32>
    %c28 = arith.constant 28 : index
    %c0_47 = arith.constant 0 : index
    %191 = vector.load %arg2[%c28, %c0_47] : memref<40x128xf32, #tpu.memory_space<vmem>>, vector<1x32xf32>
    %c29 = arith.constant 29 : index
    %c0_48 = arith.constant 0 : index
    %192 = vector.load %arg2[%c29, %c0_48] : memref<40x128xf32, #tpu.memory_space<vmem>>, vector<1x32xf32>
    %cst_49 = arith.constant dense<0.000000e+00> : vector<16xf32>
    %193 = vector.multi_reduction <add>, %190, %cst_49 [1] : vector<16x32xf32> to vector<16xf32>
    %194 = vector.shape_cast %193 : vector<16xf32> to vector<16x1xf32>
    %cst_50 = arith.constant 3.200000e+01 : f32
    %195 = vector.broadcast %cst_50 : f32 to vector<16x1xf32>
    %196 = arith.divf %194, %195 : vector<16x1xf32>
    %197 = vector.broadcast %196 : vector<16x1xf32> to vector<16x32xf32>
    %198 = arith.subf %190, %197 : vector<16x32xf32>
    %199 = arith.mulf %198, %198 : vector<16x32xf32>
    %cst_51 = arith.constant dense<0.000000e+00> : vector<16xf32>
    %200 = vector.multi_reduction <add>, %199, %cst_51 [1] : vector<16x32xf32> to vector<16xf32>
    %201 = vector.shape_cast %200 : vector<16xf32> to vector<16x1xf32>
    %cst_52 = arith.constant 3.200000e+01 : f32
    %202 = vector.broadcast %cst_52 : f32 to vector<16x1xf32>
    %203 = arith.divf %201, %202 : vector<16x1xf32>
    %204 = vector.broadcast %196 : vector<16x1xf32> to vector<16x32xf32>
    %205 = arith.subf %190, %204 : vector<16x32xf32>
    %cst_53 = arith.constant 9.99999974E-6 : f32
    %206 = vector.broadcast %cst_53 : f32 to vector<16x1xf32>
    %207 = arith.addf %203, %206 : vector<16x1xf32>
    %208 = math.rsqrt %207 : vector<16x1xf32>
    %209 = vector.broadcast %208 : vector<16x1xf32> to vector<16x32xf32>
    %210 = arith.mulf %205, %209 : vector<16x32xf32>
    %211 = vector.broadcast %191 : vector<1x32xf32> to vector<16x32xf32>
    %212 = arith.mulf %210, %211 : vector<16x32xf32>
    %213 = vector.broadcast %192 : vector<1x32xf32> to vector<16x32xf32>
    %214 = arith.addf %212, %213 : vector<16x32xf32>
    %c288 = arith.constant 288 : index
    %c0_54 = arith.constant 0 : index
    %215 = vector.load %arg1[%c288, %c0_54] : memref<560x128xf32, #tpu.memory_space<vmem>>, vector<32x128xf32>
    %cst_55 = arith.constant dense<0.000000e+00> : vector<16x128xf32>
    %216 = tpu.matmul %214, %215, %cst_55 {dimension_numbers = #tpu.dot_dimension_numbers<[1], [0], [0], [1], [0, 0, 1, 1], [], []>} : vector<16x32xf32>, vector<32x128xf32>, vector<16x128xf32> -> vector<16x128xf32>
    %c26 = arith.constant 26 : index
    %c0_56 = arith.constant 0 : index
    %217 = vector.load %arg2[%c26, %c0_56] : memref<40x128xf32, #tpu.memory_space<vmem>>, vector<1x128xf32>
    %218 = vector.broadcast %217 : vector<1x128xf32> to vector<16x128xf32>
    %219 = arith.addf %216, %218 : vector<16x128xf32>
    %cst_57 = arith.constant 5.000000e-01 : f32
    %220 = vector.broadcast %cst_57 : f32 to vector<16x128xf32>
    %221 = arith.mulf %220, %219 : vector<16x128xf32>
    %cst_58 = arith.constant 4.471500e-02 : f32
    %222 = vector.broadcast %cst_58 : f32 to vector<16x128xf32>
    %223 = arith.mulf %222, %219 : vector<16x128xf32>
    %224 = arith.mulf %223, %219 : vector<16x128xf32>
    %225 = arith.mulf %224, %219 : vector<16x128xf32>
    %226 = arith.addf %219, %225 : vector<16x128xf32>
    %cst_59 = arith.constant 0.797884583 : f32
    %227 = vector.broadcast %cst_59 : f32 to vector<16x128xf32>
    %228 = arith.mulf %227, %226 : vector<16x128xf32>
    %229 = math.tanh %228 : vector<16x128xf32>
    %cst_60 = arith.constant 1.000000e+00 : f32
    %230 = vector.broadcast %cst_60 : f32 to vector<16x128xf32>
    %231 = arith.addf %230, %229 : vector<16x128xf32>
    %232 = arith.mulf %221, %231 : vector<16x128xf32>
    %c320 = arith.constant 320 : index
    %c0_61 = arith.constant 0 : index
    %233 = vector.load %arg1[%c320, %c0_61] : memref<560x128xf32, #tpu.memory_space<vmem>>, vector<128x32xf32>
    %cst_62 = arith.constant dense<0.000000e+00> : vector<16x32xf32>
    %234 = tpu.matmul %232, %233, %cst_62 {dimension_numbers = #tpu.dot_dimension_numbers<[1], [0], [0], [1], [0, 0, 1, 1], [], []>} : vector<16x128xf32>, vector<128x32xf32>, vector<16x32xf32> -> vector<16x32xf32>
    %c27 = arith.constant 27 : index
    %c0_63 = arith.constant 0 : index
    %235 = vector.load %arg2[%c27, %c0_63] : memref<40x128xf32, #tpu.memory_space<vmem>>, vector<1x32xf32>
    %236 = vector.broadcast %235 : vector<1x32xf32> to vector<16x32xf32>
    %237 = arith.addf %234, %236 : vector<16x32xf32>
    %238 = arith.addf %214, %237 : vector<16x32xf32>
    %c30 = arith.constant 30 : index
    %c0_64 = arith.constant 0 : index
    %239 = vector.load %arg2[%c30, %c0_64] : memref<40x128xf32, #tpu.memory_space<vmem>>, vector<1x32xf32>
    %c31 = arith.constant 31 : index
    %c0_65 = arith.constant 0 : index
    %240 = vector.load %arg2[%c31, %c0_65] : memref<40x128xf32, #tpu.memory_space<vmem>>, vector<1x32xf32>
    %cst_66 = arith.constant dense<0.000000e+00> : vector<16xf32>
    %241 = vector.multi_reduction <add>, %238, %cst_66 [1] : vector<16x32xf32> to vector<16xf32>
    %242 = vector.shape_cast %241 : vector<16xf32> to vector<16x1xf32>
    %cst_67 = arith.constant 3.200000e+01 : f32
    %243 = vector.broadcast %cst_67 : f32 to vector<16x1xf32>
    %244 = arith.divf %242, %243 : vector<16x1xf32>
    %245 = vector.broadcast %244 : vector<16x1xf32> to vector<16x32xf32>
    %246 = arith.subf %238, %245 : vector<16x32xf32>
    %247 = arith.mulf %246, %246 : vector<16x32xf32>
    %cst_68 = arith.constant dense<0.000000e+00> : vector<16xf32>
    %248 = vector.multi_reduction <add>, %247, %cst_68 [1] : vector<16x32xf32> to vector<16xf32>
    %249 = vector.shape_cast %248 : vector<16xf32> to vector<16x1xf32>
    %cst_69 = arith.constant 3.200000e+01 : f32
    %250 = vector.broadcast %cst_69 : f32 to vector<16x1xf32>
    %251 = arith.divf %249, %250 : vector<16x1xf32>
    %252 = vector.broadcast %244 : vector<16x1xf32> to vector<16x32xf32>
    %253 = arith.subf %238, %252 : vector<16x32xf32>
    %cst_70 = arith.constant 9.99999974E-6 : f32
    %254 = vector.broadcast %cst_70 : f32 to vector<16x1xf32>
    %255 = arith.addf %251, %254 : vector<16x1xf32>
    %256 = math.rsqrt %255 : vector<16x1xf32>
    %257 = vector.broadcast %256 : vector<16x1xf32> to vector<16x32xf32>
    %258 = arith.mulf %253, %257 : vector<16x32xf32>
    %259 = vector.broadcast %239 : vector<1x32xf32> to vector<16x32xf32>
    %260 = arith.mulf %258, %259 : vector<16x32xf32>
    %261 = vector.broadcast %240 : vector<1x32xf32> to vector<16x32xf32>
    %262 = arith.addf %260, %261 : vector<16x32xf32>
    %c0_71 = arith.constant 0 : index
    %c0_72 = arith.constant 0 : index
    %263 = vector.load %arg3[%c0_71, %c0_72] : memref<16x34xf32, #tpu.memory_space<vmem>>, vector<16x32xf32>
    tpu.vector_store %arg3[%c0_71, %c0_72], %262 {strides = array<i32>} : memref<16x34xf32, #tpu.memory_space<vmem>>, vector<16x32xf32>,
    %c15_i32 = arith.constant 15 : i32
    %264 = tpu.dynamic_rotate %262 by %c15_i32 dim 0 : vector<16x32xf32>, i32 -> vector<16x32xf32>
    %c448 = arith.constant 448 : index
    %c0_73 = arith.constant 0 : index
    %265 = vector.load %arg1[%c448, %c0_73] : memref<560x128xf32, #tpu.memory_space<vmem>>, vector<32x48xf32>
    %cst_74 = arith.constant dense<0.000000e+00> : vector<16x48xf32>
    %266 = tpu.matmul %262, %265, %cst_74 {dimension_numbers = #tpu.dot_dimension_numbers<[1], [0], [0], [1], [0, 0, 1, 1], [], []>} : vector<16x32xf32>, vector<32x48xf32>, vector<16x48xf32> -> vector<16x48xf32>
    %c480 = arith.constant 480 : index
    %c0_75 = arith.constant 0 : index
    %267 = vector.load %arg1[%c480, %c0_75] : memref<560x128xf32, #tpu.memory_space<vmem>>, vector<32x48xf32>
    %cst_76 = arith.constant dense<0.000000e+00> : vector<16x48xf32>
    %268 = tpu.matmul %264, %267, %cst_76 {dimension_numbers = #tpu.dot_dimension_numbers<[1], [0], [0], [1], [0, 0, 1, 1], [], []>} : vector<16x32xf32>, vector<32x48xf32>, vector<16x48xf32> -> vector<16x48xf32>
    %269 = arith.addf %266, %268 : vector<16x48xf32>
    %c32_77 = arith.constant 32 : index
    %c0_78 = arith.constant 0 : index
    %270 = vector.load %arg2[%c32_77, %c0_78] : memref<40x128xf32, #tpu.memory_space<vmem>>, vector<1x48xf32>
    %271 = vector.broadcast %270 : vector<1x48xf32> to vector<16x48xf32>
    %272 = arith.addf %269, %271 : vector<16x48xf32>
    %cst_79 = arith.constant 5.000000e-01 : f32
    %273 = vector.broadcast %cst_79 : f32 to vector<16x48xf32>
    %274 = arith.mulf %273, %272 : vector<16x48xf32>
    %cst_80 = arith.constant 4.471500e-02 : f32
    %275 = vector.broadcast %cst_80 : f32 to vector<16x48xf32>
    %276 = arith.mulf %275, %272 : vector<16x48xf32>
    %277 = arith.mulf %276, %272 : vector<16x48xf32>
    %278 = arith.mulf %277, %272 : vector<16x48xf32>
    %279 = arith.addf %272, %278 : vector<16x48xf32>
    %cst_81 = arith.constant 0.797884583 : f32
    %280 = vector.broadcast %cst_81 : f32 to vector<16x48xf32>
    %281 = arith.mulf %280, %279 : vector<16x48xf32>
    %282 = math.tanh %281 : vector<16x48xf32>
    %cst_82 = arith.constant 1.000000e+00 : f32
    %283 = vector.broadcast %cst_82 : f32 to vector<16x48xf32>
    %284 = arith.addf %283, %282 : vector<16x48xf32>
    %285 = arith.mulf %274, %284 : vector<16x48xf32>
    %c512 = arith.constant 512 : index
    %c0_83 = arith.constant 0 : index
    %286 = vector.load %arg1[%c512, %c0_83] : memref<560x128xf32, #tpu.memory_space<vmem>>, vector<48x2xf32>
    %cst_84 = arith.constant dense<0.000000e+00> : vector<16x2xf32>
    %287 = tpu.matmul %285, %286, %cst_84 {dimension_numbers = #tpu.dot_dimension_numbers<[1], [0], [0], [1], [0, 0, 1, 1], [], []>} : vector<16x48xf32>, vector<48x2xf32>, vector<16x2xf32> -> vector<16x2xf32>
    %c33 = arith.constant 33 : index
    %c0_85 = arith.constant 0 : index
    %288 = vector.load %arg2[%c33, %c0_85] : memref<40x128xf32, #tpu.memory_space<vmem>>, vector<1x2xf32>
    %289 = vector.broadcast %288 : vector<1x2xf32> to vector<16x2xf32>
    %290 = arith.addf %287, %289 : vector<16x2xf32>
    %291 = arith.negf %290 : vector<16x2xf32>
    %292 = math.exp %291 : vector<16x2xf32>
    %cst_86 = arith.constant 1.000000e+00 : f32
    %293 = vector.broadcast %cst_86 : f32 to vector<16x2xf32>
    %294 = arith.addf %293, %292 : vector<16x2xf32>
    %295 = arith.divf %293, %294 : vector<16x2xf32>
    %c0_87 = arith.constant 0 : index
    %c32_88 = arith.constant 32 : index
    %296 = vector.load %arg3[%c0_87, %c32_88] : memref<16x34xf32, #tpu.memory_space<vmem>>, vector<16x2xf32>
    tpu.vector_store %arg3[%c0_87, %c32_88], %295 {strides = array<i32>} : memref<16x34xf32, #tpu.memory_space<vmem>>, vector<16x2xf32>,
    return
  }
}

</mosaic_0001>

<bundles_post_ra>
// kernel: segmentation_transformer_forward.1
= control target key start
LH: loop header
LB: loop body
LE: loop exit
PB: predicated region body
PF: predicated region fallthrough
CT: control target
= control target key end

     0   :  { %vm29_vm0 = vcmask 261120   ;;  %v4809_v14 = vmov 0.0   ;;  %s4811_s30 = smov 120   ;;  %vm4812_vm1 = vmmov 0   ;;  %s4813_s4 = smov 104   ;;  %vm127_vm2 = vcmask 64512   ;;  %s5554_s1 = inlined_call_operand.vmem [shape: f32[560,128], index: 1, kind: input, shape index: {}]   ;;  %s5555_s0 = inlined_call_operand.vmem [shape: f32[16,32], index: 0, kind: input, shape index: {}]   ;;  %s5556_s2 = inlined_call_operand.vmem [shape: f32[40,128], index: 2, kind: input, shape index: {}]   ;;  %s5557_s3 = inlined_call_operand.vmem [shape: f32[16,34], index: 3, kind: output, shape index: {}]  }
   0x1   :  { %v20_v0 = vld [vmem:[%s5554_s1] sm:$0xff]  ;;  %v21_v1 = vld [vmem:[%s5554_s1 + $0x8] sm:$0xff]  ;;  %v22_v2 = vld [vmem:[%s5554_s1 + $0x10] sm:$0xff]  ;;  %4234 = vmatprep.subr.mxu1 %v4809_v14  ;;  %4236 = vmatprep.mubr.msk.f32.mxu1 %vm4812_vm1, %v4809_v14  ;;  %s4814_s5 = smov 96   ;;  %s4815_s6 = smov 64   ;;  %vm1456_vm3 = vcmask 130048  }
   0x2   :  { %v4556_v3 = vpack.c.bf16 %v21_v1, %v20_v0  ;;  %v23_v4 = vld [vmem:[%s5554_s1 + $0x18] sm:$0xff]  ;;  %v14_v5 = vld [vmem:[%s5555_s0] sm:$0xff]  ;;  %v15_v9 = vld [vmem:[%s5555_s0 + $0x8] sm:$0xff]  ;;  %s4810_s0 = smov 112   ;;  %s4816_s15 = smov 8   ;;  %vm1459_vm4 = vcmask 195584  }
   0x3   :  { %v4560_v6 = vpack.c.bf16 %v23_v4, %v22_v2  ;;  %v16_v7 = vld [vmem:[%s5556_s2] sm:$0xff]  ;;  %v17_v10 = vld [vmem:[%s5556_s2 + $0x8] sm:$0xff]  ;;  %v3981_v12 = vld [vmem:[%s5556_s2 + $0x10] ss:$0 sm:$0xff]  ;;  %s4817_s16 = smov 16   ;;  %s4818_s17 = smov 24  }
   0x4   :  { %4557 = vmatprep.subr.bf16.mxu0 %v4556_v3  ;;  %v4858_v8 = vadd.f32 %v16_v7, %v14_v5  ;;  %v4868_v11 = vadd.f32 %v17_v10, %v15_v9  ;;  %vm3872_vm6 = vcmask 392192   ;;  %s4819_s27 = smov 32   ;;  %vm3974_vm7 = vcmask 277760  }
   0x5   :  { %4559 = vmatpush3.bf16.msra.mxu0 %v4556_v3 }
   0x6   :  { %4561 = vmatprep.subr.bf16.mxu0 %v4560_v6  ;;  %4231 = vmatprep.mubr.msk.f32.mxu0 %vm29_vm0, %v4858_v8 }
   0x9   :  { %4563 = vmatpush3.bf16.msra.mxu0 %v4560_v6 }
   0xa   :  { %4244 = vmatprep.subr.mxu0 %v4809_v14 }
   0xc   :  { %4232 = vmatmul.mubr.msk.f32.vlgmr.msra.gmra.mrb[0].mxu0 %vm29_vm0, %v4868_v11 }
   0xd   :  { %4246 = vmatprep.mubr.msk.f32.mxu0 %vm4812_vm1, %v4809_v14 }
  0xdf   :  { %v4233_v13 = vpop.f32.mrb[0].mxu0 }
  0xe0   :  { %v102_v15 = vpop.f32.mrb[1].mxu0  ;;  %v4887_v17 = vadd.f32 %v4233_v13, %v3981_v12 }
  0xe1   :  { %v4877_v16 = vadd.f32 %v3981_v12, %v102_v15 }
  0xe3   :  { %117 = vrot.lane.b32.xlu1 %v4877_v16, %s4810_s0  ;;  %113 = vrot.lane.b32.xlu0 %v4877_v16, %s4811_s30 }
  0xe7   :  { %119 = vrot.lane.b32.xlu1 %v4887_v17, %s4810_s0  ;;  %115 = vrot.lane.b32.xlu0 %v4887_v17, %s4811_s30 }
  0xeb   :  { %123 = vrot.lane.b32.xlu1 %v4887_v17, %s4813_s4  ;;  %121 = vrot.lane.b32.xlu0 %v4877_v16, %s4813_s4 }
  0xef   :  { %202 = vrot.lane.b32.xlu1 %v4887_v17, %s4814_s5  ;;  %125 = vrot.lane.b32.xlu0 %v4877_v16, %s4814_s5 }
 0x155   :  { %v4901_v18 = vpop.permute.xlu1 %117  ;;  %v4903_v19 = vpop.permute.xlu0 %113 }
 0x156   :  { %278 = vrot.lane.b32.xlu0 %v4903_v19, %s4814_s5 }
 0x159   :  { %v4907_v20 = vpop.permute.xlu1 %119  ;;  %v4909_v21 = vpop.permute.xlu0 %115 }
 0x15a   :  { %430 = vrot.lane.b32.xlu0 %v4901_v18, %s4814_s5  ;;  %354 = vrot.lane.b32.xlu1 %v4909_v21, %s4814_s5 }
 0x15d   :  { %v4915_v22 = vpop.permute.xlu0 %121  ;;  %v4921_v23 = vpop.permute.xlu1 %123 }
 0x15e   :  { %506 = vrot.lane.b32.xlu1 %v4907_v20, %s4814_s5  ;;  %582 = vrot.lane.b32.xlu0 %v4915_v22, %s4814_s5 }
 0x161   :  { %v126_v24 = vpop.permute.xlu0 %125  ;;  %v203_v25 = vpop.permute.xlu1 %202 }
 0x162   :  { %658 = vrot.lane.b32.xlu1 %v4921_v23, %s4814_s5  ;;  %4235 = vmatpush3.xpose.msk.msra.mxu1 %vm127_vm2, %v126_v24 }
 0x163   :  { %4239 = vmatprep.subr.mxu1 %v4809_v14 }
 0x165   :  { %4237 = vmatmul.mubr.msk.f32.vlgmr.msra.gmra.mrb[0].mxu1 %vm127_vm2, %v4877_v16 }
 0x166   :  { %4240 = vmatpush3.xpose.msk.msra.mxu1 %vm127_vm2, %v203_v25  ;;  %4241 = vmatprep.mubr.msk.f32.mxu1 %vm4812_vm1, %v4809_v14 }
 0x167   :  { %4249 = vmatprep.subr.mxu1 %v4809_v14 }
 0x169   :  { %4242 = vmatmul.mubr.msk.f32.vlgmr.msra.gmra.mrb[2].mxu1 %vm127_vm2, %v4887_v17 }
 0x16a   :  { %4251 = vmatprep.mubr.msk.f32.mxu1 %vm4812_vm1, %v4809_v14 }
 0x1c8   :  { %v279_v26 = vpop.permute.xlu0 %278 }
 0x1c9   :  { %4245 = vmatpush3.xpose.msk.msra.mxu0 %vm127_vm2, %v279_v26 }
 0x1ca   :  { %4254 = vmatprep.subr.mxu0 %v4809_v14 }
 0x1cc   :  { %v355_v27 = vpop.permute.xlu1 %354  ;;  %4247 = vmatmul.mubr.msk.f32.vlgmr.msra.gmra.mrb[2].mxu0 %vm127_vm2, %v4903_v19  ;;  %v431_v28 = vpop.permute.xlu0 %430 }
 0x1cd   :  { %4250 = vmatpush3.xpose.msk.msra.mxu1 %vm127_vm2, %v355_v27  ;;  %4255 = vmatpush3.xpose.msk.msra.mxu0 %vm127_vm2, %v431_v28 }
 0x1ce   :  { %4256 = vmatprep.mubr.msk.f32.mxu0 %vm4812_vm1, %v4809_v14  ;;  %4259 = vmatprep.subr.mxu1 %v4809_v14 }
 0x1cf   :  { %4264 = vmatprep.subr.mxu0 %v4809_v14 }
 0x1d0   :  { %v507_v29 = vpop.permute.xlu1 %506  ;;  %4252 = vmatmul.mubr.msk.f32.vlgmr.msra.gmra.mrb[4].mxu1 %vm127_vm2, %v4909_v21  ;;  %4257 = vmatmul.mubr.msk.f32.vlgmr.msra.gmra.mrb[4].mxu0 %vm127_vm2, %v4901_v18  ;;  %v583_v30 = vpop.permute.xlu0 %582 }
 0x1d1   :  { %4260 = vmatpush3.xpose.msk.msra.mxu1 %vm127_vm2, %v507_v29  ;;  %4265 = vmatpush3.xpose.msk.msra.mxu0 %vm127_vm2, %v583_v30 }
 0x1d2   :  { %4261 = vmatprep.mubr.msk.f32.mxu1 %vm4812_vm1, %v4809_v14  ;;  %4266 = vmatprep.mubr.msk.f32.mxu0 %vm4812_vm1, %v4809_v14 }
 0x1d3   :  { %4269 = vmatprep.subr.mxu1 %v4809_v14  ;;  %4274 = vmatprep.subr.mxu0 %v4809_v14 }
 0x1d4   :  { %v659_v31 = vpop.permute.xlu1 %658  ;;  %4262 = vmatmul.mubr.msk.f32.vlgmr.msra.gmra.mrb[6].mxu1 %vm127_vm2, %v4907_v20  ;;  %4267 = vmatmul.mubr.msk.f32.vlgmr.msra.gmra.mrb[6].mxu0 %vm127_vm2, %v4915_v22 }
 0x1d5   :  { %4270 = vmatpush3.xpose.msk.msra.mxu1 %vm127_vm2, %v659_v31  ;;  %4271 = vmatprep.mubr.msk.f32.mxu1 %vm4812_vm1, %v4809_v14 }
 0x1d6   :  { %4279 = vmatprep.subr.mxu1 %v4809_v14  ;;  %4276 = vmatprep.mubr.msk.f32.mxu0 %vm4812_vm1, %v4809_v14 }
 0x1d8   :  { %4272 = vmatmul.mubr.msk.f32.vlgmr.msra.gmra.mrb[8].mxu1 %vm127_vm2, %v4921_v23 }
 0x1d9   :  { %4281 = vmatprep.mubr.msk.f32.mxu1 %vm4812_vm1, %v4809_v14 }
 0x238   :  { %v198_v32 = vpop.f32.mrb[0].mxu1 }
 0x239   :  { %v4238_v33 = vpop.f32.mrb[1].mxu1  ;;  %v734_v34 = vsel %vm127_vm2, %v198_v32, -inf }
 0x23a   :  { %735 = vmax.xlane.f32.xlu0 %v734_v34 }
 0x23c   :  { %v274_v35 = vpop.f32.mrb[2].mxu1 }
 0x23d   :  { %v4243_v36 = vpop.f32.mrb[3].mxu1  ;;  %v737_v37 = vsel %vm127_vm2, %v274_v35, -inf }
 0x23e   :  { %738 = vmax.xlane.f32.xlu1 %v737_v37 }
 0x29f   :  { %v350_v38 = vpop.f32.mrb[2].mxu0 }
 0x2a0   :  { %v4248_v39 = vpop.f32.mrb[3].mxu0  ;;  %v740_v40 = vsel %vm127_vm2, %v350_v38, -inf }
 0x2a1   :  { %741 = vmax.xlane.f32.xlu0 %v740_v40 }
 0x2a3   :  { %v426_v41 = vpop.f32.mrb[4].mxu1  ;;  %v502_v42 = vpop.f32.mrb[4].mxu0 }
 0x2a4   :  { %v4253_v43 = vpop.f32.mrb[5].mxu1  ;;  %v4258_v44 = vpop.f32.mrb[5].mxu0  ;;  %v743_v45 = vsel %vm127_vm2, %v426_v41, -inf  ;;  %v746_v46 = vsel %vm127_vm2, %v502_v42, -inf }
 0x2a5   :  { %744 = vmax.xlane.f32.xlu0 %v743_v45  ;;  %747 = vmax.xlane.f32.xlu1 %v746_v46 }
 0x2a7   :  { %v578_v47 = vpop.f32.mrb[6].mxu1  ;;  %v654_v48 = vpop.f32.mrb[6].mxu0 }
 0x2a8   :  { %v4263_v49 = vpop.f32.mrb[7].mxu1  ;;  %v4268_v50 = vpop.f32.mrb[7].mxu0  ;;  %v749_v51 = vsel %vm127_vm2, %v578_v47, -inf  ;;  %v752_v52 = vsel %vm127_vm2, %v654_v48, -inf }
 0x2a9   :  { %750 = vmax.xlane.f32.xlu0 %v749_v51  ;;  %753 = vmax.xlane.f32.xlu1 %v752_v52 }
 0x2ab   :  { %v730_v53 = vpop.f32.mrb[8].mxu1 }
 0x2ac   :  { %v4273_v54 = vpop.f32.mrb[9].mxu1  ;;  %v755_v55 = vsel %vm127_vm2, %v730_v53, -inf }
 0x2ad   :  { %756 = vmax.xlane.f32.xlu0 %v755_v55 }
 0x2ba   :  { %822 = vrot.lane.b32.xlu1 %v4877_v16, %s4815_s6 }
 0x2be   :  { %974 = vrot.lane.b32.xlu1 %v4903_v19, %s4815_s6 }
 0x2c2   :  { %1050 = vrot.lane.b32.xlu1 %v4909_v21, %s4815_s6 }
 0x2c3   :  { %898 = vrot.lane.b32.xlu0 %v4887_v17, %s4815_s6 }
 0x2c6   :  { %1202 = vrot.lane.b32.xlu1 %v4907_v20, %s4815_s6 }
 0x2c7   :  { %1126 = vrot.lane.b32.xlu0 %v4901_v18, %s4815_s6  ;;  %v736_v58 = vpop.xlane.xlu0 %735 }
 0x2c8   :  { %v758_v59 = vsub.f32 %v198_v32, %v736_v58 }
 0x2ca   :  { %v766_v61 = vmul.f32 1.442695, %v758_v59 }
 0x2cb   :  { %v739_v56 = vpop.xlane.xlu1 %738 }
 0x2cc   :  { %v759_v57 = vsub.f32 %v274_v35, %v739_v56 }
 0x2ce   :  { %v768_v60 = vmul.f32 1.442695, %v759_v57 }
 0x2d0   :  { %4709 = vpow2.f32 %v768_v60 }
 0x2d1   :  { %4711 = vpow2.f32 %v766_v61 }
 0x2da   :  { %v4993_v62 = vpop.eup %4709 }
 0x2db   :  { %v785_v63 = vsel %vm127_vm2, %v4993_v62, 0.0  ;;  %v4997_v0 = vpop.eup %4711 }
 0x2dc   :  { %v782_v1 = vsel %vm127_vm2, %v4997_v0, 0.0 }
 0x2e6   :  { %786 = vadd.xlane.f32.xlu0 %v785_v63 }
 0x2ea   :  { %783 = vadd.xlane.f32.xlu1 %v782_v1 }
 0x32e   :  { %v742_v2 = vpop.xlane.xlu0 %741 }
 0x32f   :  { %v760_v3 = vsub.f32 %v350_v38, %v742_v2 }
 0x331   :  { %v770_v4 = vmul.f32 1.442695, %v760_v3 }
 0x332   :  { %v748_v5 = vpop.xlane.xlu1 %747  ;;  %v745_v6 = vpop.xlane.xlu0 %744 }
 0x333   :  { %4713 = vpow2.f32 %v770_v4  ;;  %v762_v7 = vsub.f32 %v502_v42, %v748_v5  ;;  %v761_v9 = vsub.f32 %v426_v41, %v745_v6 }
 0x335   :  { %v774_v10 = vmul.f32 1.442695, %v762_v7  ;;  %v772_v12 = vmul.f32 1.442695, %v761_v9  ;;  %v1462_v7 = vld [vmem:[%s5554_s1 + $0x20] sm:$0xff]  ;;  %v1463_v9 = vld [vmem:[%s5554_s1 + $0x28] sm:$0xff] }
 0x336   :  { %v754_v13 = vpop.xlane.xlu1 %753  ;;  %v751_v15 = vpop.xlane.xlu0 %750 }
 0x337   :  { %4715 = vpow2.f32 %v774_v10  ;;  %v764_v16 = vsub.f32 %v654_v48, %v754_v13  ;;  %v763_v17 = vsub.f32 %v578_v47, %v751_v15  ;;  %v4564_v10 = vpack.c.bf16 %v1463_v9, %v1462_v7  ;;  %v1465_v13 = vld [vmem:[%s5554_s1 + $0x38] sm:$0xff] }
 0x338   :  { %4717 = vpow2.f32 %v772_v12  ;;  %v1464_v12 = vld [vmem:[%s5554_s1 + $0x30] sm:$0xff] }
 0x339   :  { %v778_v18 = vmul.f32 1.442695, %v764_v16  ;;  %v776_v19 = vmul.f32 1.442695, %v763_v17  ;;  %v4568_v15 = vpack.c.bf16 %v1465_v13, %v1464_v12  ;;  %v4012_v13 = vld [vmem:[%s5556_s2 + $0x15] ss:$0 sm:$0xff] }
 0x33a   :  { %v823_v20 = vpop.permute.xlu1 %822  ;;  %v757_v21 = vpop.xlane.xlu0 %756 }
 0x33b   :  { %4719 = vpow2.f32 %v778_v18  ;;  %v765_v24 = vsub.f32 %v730_v53, %v757_v21  ;;  %4275 = vmatpush3.msra.mxu0 %v823_v20 }
 0x33c   :  { %4721 = vpow2.f32 %v776_v19  ;;  %4284 = vmatprep.subr.mxu0 %v4809_v14 }
 0x33d   :  { %v4714_v25 = vpop.eup %4713  ;;  %v780_v26 = vmul.f32 1.442695, %v765_v24 }
 0x33e   :  { %v899_v27 = vpop.permute.xlu0 %898  ;;  %v788_v28 = vsel %vm127_vm2, %v4714_v25, 0.0  ;;  %v975_v39 = vpop.permute.xlu1 %974 }
 0x33f   :  { %4723 = vpow2.f32 %v780_v26  ;;  %789 = vadd.xlane.f32.xlu1 %v788_v28  ;;  %4280 = vmatpush3.msra.mxu1 %v899_v27 }
 0x340   :  { %4289 = vmatprep.subr.mxu1 %v4809_v14 }
 0x341   :  { %v4716_v29 = vpop.eup %4715 }
 0x342   :  { %v4718_v30 = vpop.eup %4717  ;;  %v794_v31 = vsel %vm127_vm2, %v4716_v29, 0.0  ;;  %v1051_v40 = vpop.permute.xlu1 %1050 }
 0x343   :  { %795 = vadd.xlane.f32.xlu1 %v794_v31  ;;  %v791_v32 = vsel %vm127_vm2, %v4718_v30, 0.0  ;;  %v1127_v41 = vpop.permute.xlu0 %1126 }
 0x344   :  { %792 = vadd.xlane.f32.xlu0 %v791_v32 }
 0x345   :  { %v4720_v33 = vpop.eup %4719 }
 0x346   :  { %v4722_v34 = vpop.eup %4721  ;;  %v800_v35 = vsel %vm127_vm2, %v4720_v33, 0.0  ;;  %v1203_v42 = vpop.permute.xlu1 %1202 }
 0x347   :  { %801 = vadd.xlane.f32.xlu1 %v800_v35  ;;  %v797_v36 = vsel %vm127_vm2, %v4722_v34, 0.0 }
 0x348   :  { %798 = vadd.xlane.f32.xlu0 %v797_v36 }
 0x349   :  { %v5008_v37 = vpop.eup %4723 }
 0x34a   :  { %v803_v38 = vsel %vm127_vm2, %v5008_v37, 0.0 }
 0x34c   :  { %804 = vadd.xlane.f32.xlu0 %v803_v38 }
 0x358   :  { %1354 = vrot.lane.b32.xlu1 %v4921_v23, %s4815_s6 }
 0x362   :  { %1278 = vrot.lane.b32.xlu0 %v4915_v22, %s4815_s6 }
 0x373   :  { %v787_v43 = vpop.xlane.xlu0 %786 }
 0x374   :  { %4725 = vrcp.f32 %v787_v43 }
 0x377   :  { %v784_v44 = vpop.xlane.xlu1 %783 }
 0x378   :  { %4727 = vrcp.f32 %v784_v44 }
 0x37e   :  { %v4726_v45 = vpop.eup %4725 }
 0x37f   :  { %v809_v46 = vmul.f32 %v4726_v45, %v4993_v62 }
 0x381   :  { %4282 = vmatmul.mubr.msk.f32.vlgmr.msra.gmra.mrb[10].mxu1 %vm127_vm2, %v809_v46 }
 0x382   :  { %v4728_v47 = vpop.eup %4727  ;;  %4290 = vmatpush3.msra.mxu1 %v1051_v40  ;;  %4291 = vmatprep.mubr.msk.f32.mxu1 %vm4812_vm1, %v4809_v14 }
 0x383   :  { %v807_v22 = vmul.f32 %v4728_v47, %v4997_v0  ;;  %4299 = vmatprep.subr.mxu1 %v4809_v14 }
 0x385   :  { %4277 = vmatmul.mubr.msk.f32.vlgmr.msra.gmra.mrb[8].mxu0 %vm127_vm2, %v807_v22 }
 0x386   :  { %4285 = vmatpush3.msra.mxu0 %v975_v39  ;;  %4286 = vmatprep.mubr.msk.f32.mxu0 %vm4812_vm1, %v4809_v14 }
 0x387   :  { %4294 = vmatprep.subr.mxu0 %v4809_v14 }
 0x3cc   :  { %v790_v23 = vpop.xlane.xlu1 %789 }
 0x3cd   :  { %4729 = vrcp.f32 %v790_v23 }
 0x3d0   :  { %v796_v48 = vpop.xlane.xlu1 %795 }
 0x3d1   :  { %4731 = vrcp.f32 %v796_v48  ;;  %v793_v49 = vpop.xlane.xlu0 %792 }
 0x3d2   :  { %4733 = vrcp.f32 %v793_v49 }
 0x3d4   :  { %v802_v50 = vpop.xlane.xlu1 %801 }
 0x3d5   :  { %4735 = vrcp.f32 %v802_v50  ;;  %v799_v51 = vpop.xlane.xlu0 %798 }
 0x3d6   :  { %4737 = vrcp.f32 %v799_v51 }
 0x3d7   :  { %v4730_v52 = vpop.eup %4729 }
 0x3d8   :  { %v811_v53 = vmul.f32 %v4730_v52, %v4714_v25  ;;  %v1355_v0 = vpop.permute.xlu1 %1354 }
 0x3d9   :  { %v805_v54 = vpop.xlane.xlu0 %804 }
 0x3da   :  { %4739 = vrcp.f32 %v805_v54  ;;  %4287 = vmatmul.mubr.msk.f32.vlgmr.msra.gmra.mrb[10].mxu0 %vm127_vm2, %v811_v53 }
 0x3db   :  { %v4732_v55 = vpop.eup %4731  ;;  %4295 = vmatpush3.msra.mxu0 %v1127_v41  ;;  %4296 = vmatprep.mubr.msk.f32.mxu0 %vm4812_vm1, %v4809_v14 }
 0x3dc   :  { %v4734_v56 = vpop.eup %4733  ;;  %v815_v57 = vmul.f32 %v4732_v55, %v4716_v29  ;;  %4304 = vmatprep.subr.mxu0 %v4809_v14 }
 0x3dd   :  { %v813_v58 = vmul.f32 %v4734_v56, %v4718_v30  ;;  %v1279_v59 = vpop.permute.xlu0 %1278 }
 0x3de   :  { %4297 = vmatmul.mubr.msk.f32.vlgmr.msra.gmra.mrb[12].mxu0 %vm127_vm2, %v815_v57 }
 0x3df   :  { %v4736_v60 = vpop.eup %4735  ;;  %4292 = vmatmul.mubr.msk.f32.vlgmr.msra.gmra.mrb[12].mxu1 %vm127_vm2, %v813_v58  ;;  %4305 = vmatpush3.msra.mxu0 %v1279_v59  ;;  %v1596_v58 = vld [vmem:[%s5554_s1 + $0x48] sm:$0xff] }
 0x3e0   :  { %v4738_v61 = vpop.eup %4737  ;;  %v819_v62 = vmul.f32 %v4736_v60, %v4720_v33  ;;  %4300 = vmatpush3.msra.mxu1 %v1203_v42  ;;  %4301 = vmatprep.mubr.msk.f32.mxu1 %vm4812_vm1, %v4809_v14  ;;  %v4008_v42 = vld [vmem:[%s5556_s2 + $0x11] ss:$0 sm:$0xff] }
 0x3e1   :  { %v817_v63 = vmul.f32 %v4738_v61, %v4722_v34  ;;  %4306 = vmatprep.mubr.msk.f32.mxu0 %vm4812_vm1, %v4809_v14  ;;  %4309 = vmatprep.subr.mxu1 %v4809_v14  ;;  %v1597_v60 = vld [vmem:[%s5554_s1 + $0x50] sm:$0xff]  ;;  %v1598_v61 = vld [vmem:[%s5554_s1 + $0x58] sm:$0xff] }
 0x3e2   :  { %4307 = vmatmul.mubr.msk.f32.vlgmr.msra.gmra.mrb[14].mxu0 %vm127_vm2, %v819_v62  ;;  %4565 = vmatprep.subr.bf16.mxu0 %v4564_v10  ;;  %v4576_v62 = vpack.c.bf16 %v1598_v61, %v1597_v60 }
 0x3e3   :  { %4302 = vmatmul.mubr.msk.f32.vlgmr.msra.gmra.mrb[14].mxu1 %vm127_vm2, %v817_v63  ;;  %4567 = vmatpush3.bf16.msra.mxu0 %v4564_v10  ;;  %v1703_v63 = vld [vmem:[%s5554_s1 + $0x60] sm:$0xff]  ;;  %v4011_v10 = vld [vmem:[%s5556_s2 + $0x14] ss:$0 sm:$0xff] }
 0x3e4   :  { %v4740_v1 = vpop.eup %4739  ;;  %4310 = vmatpush3.msra.mxu1 %v1355_v0  ;;  %4311 = vmatprep.mubr.msk.f32.mxu1 %vm4812_vm1, %v4809_v14  ;;  %v1704_v0 = vld [vmem:[%s5554_s1 + $0x68] sm:$0xff] }
 0x3e5   :  { %v821_v2 = vmul.f32 %v4740_v1, %v5008_v37  ;;  %4569 = vmatprep.subr.bf16.mxu0 %v4568_v15  ;;  %v4580_v1 = vpack.c.bf16 %v1704_v0, %v1703_v63  ;;  %v4016_v63 = vld [vmem:[%s5556_s2 + $0x13] ss:$0 sm:$0xff] }
 0x3e7   :  { %4312 = vmatmul.mubr.msk.f32.vlgmr.msra.gmra.mrb[16].mxu1 %vm127_vm2, %v821_v2  ;;  %4571 = vmatpush3.bf16.msra.mxu0 %v4568_v15 }
 0x3e8   :  { %4581 = vmatprep.subr.bf16.mxu0 %v4580_v1 }
 0x454   :  { %v970_v3 = vpop.f32.mrb[10].mxu1 }
 0x455   :  { %v4283_v4 = vpop.f32.mrb[11].mxu1 }
 0x458   :  { %v894_v5 = vpop.f32.mrb[8].mxu0 }
 0x459   :  { %v4278_v6 = vpop.f32.mrb[9].mxu0 }
 0x4ad   :  { %v1046_v16 = vpop.f32.mrb[10].mxu0 }
 0x4ae   :  { %v4288_v17 = vpop.f32.mrb[11].mxu0  ;;  %1432 = vrot.lane.b32.xlu0 %v1046_v16, %s4816_s15 }
 0x4b1   :  { %v1198_v18 = vpop.f32.mrb[12].mxu0 }
 0x4b2   :  { %v1122_v19 = vpop.f32.mrb[12].mxu1  ;;  %1440 = vrot.lane.b32.xlu0 %v1198_v18, %s4817_s16  ;;  %v4298_v20 = vpop.f32.mrb[13].mxu0 }
 0x4b3   :  { %1434 = vrot.lane.b32.xlu1 %v1122_v19, %s4816_s15  ;;  %v4293_v21 = vpop.f32.mrb[13].mxu1 }
 0x4b4   :  { %v1705_v21 = vld [vmem:[%s5554_s1 + $0x70] sm:$0xff] }
 0x4b5   :  { %v1350_v24 = vpop.f32.mrb[14].mxu0 }
 0x4b6   :  { %v1274_v25 = vpop.f32.mrb[14].mxu1  ;;  %1448 = vrot.lane.b32.xlu0 %v1350_v24, %s4818_s17  ;;  %v4308_v26 = vpop.f32.mrb[15].mxu0  ;;  %v1706_v24 = vld [vmem:[%s5554_s1 + $0x78] sm:$0xff] }
 0x4b7   :  { %1442 = vrot.lane.b32.xlu1 %v1274_v25, %s4817_s16  ;;  %v4303_v27 = vpop.f32.mrb[15].mxu1  ;;  %v4584_v25 = vpack.c.bf16 %v1706_v24, %v1705_v21  ;;  %v1707_v26 = vld [vmem:[%s5554_s1 + $0x80] sm:$0xff]  ;;  %v1842_v24 = vld [vmem:[%s5554_s1 + $0xe8] sm:$0xff] }
 0x4b8   :  { %v1708_v27 = vld [vmem:[%s5554_s1 + $0x88] sm:$0xff] }
 0x4ba   :  { %v1426_v28 = vpop.f32.mrb[16].mxu1 }
 0x4bb   :  { %1450 = vrot.lane.b32.xlu1 %v1426_v28, %s4818_s17  ;;  %v4313_v29 = vpop.f32.mrb[17].mxu1  ;;  %v4588_v28 = vpack.c.bf16 %v1708_v27, %v1707_v26  ;;  %v1843_v26 = vld [vmem:[%s5554_s1 + $0xf0] sm:$0xff]  ;;  %v1844_v27 = vld [vmem:[%s5554_s1 + $0xf8] sm:$0xff] }
 0x4bc   :  { %v1709_v29 = vld [vmem:[%s5554_s1 + $0x90] sm:$0xff] }
 0x520   :  { %v1433_v30 = vpop.permute.xlu0 %1432 }
 0x521   :  { %v1454_v33 = vsel %vm127_vm2, %v894_v5, %v1433_v30  ;;  %v1710_v30 = vld [vmem:[%s5554_s1 + $0x98] sm:$0xff] }
 0x524   :  { %v1441_v31 = vpop.permute.xlu0 %1440 }
 0x525   :  { %v1435_v32 = vpop.permute.xlu1 %1434  ;;  %v1457_v34 = vsel %vm1456_vm3, %v1454_v33, %v1441_v31  ;;  %v4592_v31 = vpack.c.bf16 %v1710_v30, %v1709_v29  ;;  %v1712_v33 = vld [vmem:[%s5554_s1 + $0xa8] sm:$0xff] }
 0x526   :  { %v1455_v38 = vsel %vm127_vm2, %v970_v3, %v1435_v32  ;;  %v1711_v32 = vld [vmem:[%s5554_s1 + $0xa0] sm:$0xff] }
 0x528   :  { %v1449_v35 = vpop.permute.xlu0 %1448 }
 0x529   :  { %v1443_v36 = vpop.permute.xlu1 %1442  ;;  %v1460_v37 = vsel %vm1459_vm4, %v1457_v34, %v1449_v35  ;;  %v4596_v34 = vpack.c.bf16 %v1712_v33, %v1711_v32  ;;  %v1713_v35 = vld [vmem:[%s5554_s1 + $0xb0] sm:$0xff] }
 0x52a   :  { %4322 = vmatprep.mubr.msk.f32.mxu0 %vm29_vm0, %v1460_v37  ;;  %v1458_v39 = vsel %vm1456_vm3, %v1455_v38, %v1443_v36  ;;  %v1714_v36 = vld [vmem:[%s5554_s1 + $0xb8] sm:$0xff]  ;;  %v1715_v38 = vld [vmem:[%s5554_s1 + $0xc0] sm:$0xff] }
 0x52b   :  { %v4600_v37 = vpack.c.bf16 %v1714_v36, %v1713_v35  ;;  %v4017_v36 = vld [vmem:[%s5556_s2 + $0x16] ss:$0 sm:$0xff] }
 0x52d   :  { %v1451_v40 = vpop.permute.xlu1 %1450 }
 0x52e   :  { %v1461_v41 = vsel %vm1459_vm4, %v1458_v39, %v1451_v40  ;;  %v1716_v39 = vld [vmem:[%s5554_s1 + $0xc8] sm:$0xff] }
 0x52f   :  { %4323 = vmatmul.mubr.msk.f32.vlgmr.msra.gmra.mrb[16].mxu0 %vm29_vm0, %v1461_v41  ;;  %v4604_v40 = vpack.c.bf16 %v1716_v39, %v1715_v38  ;;  %v1717_v41 = vld [vmem:[%s5554_s1 + $0xd0] sm:$0xff] }
 0x530   :  { %4583 = vmatpush3.bf16.msra.mxu0 %v4580_v1 }
 0x531   :  { %4585 = vmatprep.subr.bf16.mxu0 %v4584_v25 }
 0x534   :  { %4587 = vmatpush3.bf16.msra.mxu0 %v4584_v25 }
 0x535   :  { %4589 = vmatprep.subr.bf16.mxu0 %v4588_v28 }
 0x538   :  { %4591 = vmatpush3.bf16.msra.mxu0 %v4588_v28  ;;  %v4616_v28 = vpack.c.bf16 %v1844_v27, %v1843_v26 }
 0x539   :  { %4593 = vmatprep.subr.bf16.mxu0 %v4592_v31 }
 0x53c   :  { %4595 = vmatpush3.bf16.msra.mxu0 %v4592_v31 }
 0x53d   :  { %4597 = vmatprep.subr.bf16.mxu0 %v4596_v34 }
 0x540   :  { %4599 = vmatpush3.bf16.msra.mxu0 %v4596_v34 }
 0x541   :  { %4601 = vmatprep.subr.bf16.mxu0 %v4600_v37 }
 0x544   :  { %4603 = vmatpush3.bf16.msra.mxu0 %v4600_v37 }
 0x545   :  { %4605 = vmatprep.subr.bf16.mxu0 %v4604_v40 }
 0x548   :  { %4607 = vmatpush3.bf16.msra.mxu0 %v4604_v40  ;;  %v4018_v40 = vld [vmem:[%s5556_s2 + $0x17] ss:$0 sm:$0xff] }
 0x602   :  { %v4324_v43 = vpop.f32.mrb[16].mxu0 }
 0x603   :  { %v1549_v44 = vadd.f32 %v4324_v43, %v4008_v42  ;;  %v1543_v45 = vpop.f32.mrb[17].mxu0 }
 0x604   :  { %v1544_v46 = vadd.f32 %v4008_v42, %v1543_v45  ;;  %v1718_v42 = vld [vmem:[%s5554_s1 + $0xd8] sm:$0xff] }
 0x605   :  { %v1553_v47 = vadd.f32 %v1549_v44, %v4868_v11  ;;  %v4608_v43 = vpack.c.bf16 %v1718_v42, %v1717_v41  ;;  %v4013_v44 = vld [vmem:[%s5556_s2 + $0x12] ss:$0 sm:$0xff] }
 0x606   :  { %v1552_v22 = vadd.f32 %v1544_v46, %v4858_v8  ;;  %v1595_v8 = vld [vmem:[%s5554_s1 + $0x40] sm:$0xff] }
 0x607   :  { %v1559_v23 = vsel %vm29_vm0, %v1553_v47, 0.0  ;;  %v4572_v59 = vpack.c.bf16 %v1596_v58, %v1595_v8  ;;  %4609 = vmatprep.subr.bf16.mxu0 %v4608_v43 }
 0x608   :  { %1560 = vadd.xlane.f32.xlu1 %v1559_v23  ;;  %v1556_v48 = vsel %vm29_vm0, %v1552_v22, 0.0  ;;  %4611 = vmatpush3.bf16.msra.mxu0 %v4608_v43 }
 0x609   :  { %1557 = vadd.xlane.f32.xlu0 %v1556_v48  ;;  %4573 = vmatprep.subr.bf16.mxu1 %v4572_v59 }
 0x60a   :  { %4575 = vmatpush3.bf16.msra.mxu1 %v4572_v59  ;;  %4412 = vmatprep.subr.mxu0 %v4809_v14 }
 0x60b   :  { %4577 = vmatprep.subr.bf16.mxu1 %v4576_v62 }
 0x60e   :  { %4579 = vmatpush3.bf16.msra.mxu1 %v4576_v62 }
 0x695   :  { %v1561_v49 = vpop.xlane.xlu1 %1560 }
 0x696   :  { %v1564_v50 = vmul.f32 0.03125, %v1561_v49  ;;  %v1558_v51 = vpop.xlane.xlu0 %1557 }
 0x697   :  { %v1563_v52 = vmul.f32 0.03125, %v1558_v51 }
 0x698   :  { %v1566_v53 = vsub.f32 %v1553_v47, %v1564_v50 }
 0x699   :  { %v1565_v54 = vsub.f32 %v1552_v22, %v1563_v52 }
 0x69a   :  { %v1568_v57 = vmul.f32 %v1566_v53, %v1566_v53 }
 0x69b   :  { %v1567_v55 = vmul.f32 %v1565_v54, %v1565_v54 }
 0x69c   :  { %v1572_v11 = vsel %vm29_vm0, %v1568_v57, 0.0 }
 0x69d   :  { %v1569_v56 = vsel %vm29_vm0, %v1567_v55, 0.0 }
 0x69e   :  { %1570 = vadd.xlane.f32.xlu0 %v1569_v56 }
 0x6a2   :  { %1573 = vadd.xlane.f32.xlu0 %v1572_v11 }
 0x72b   :  { %v1571_v2 = vpop.xlane.xlu0 %1570 }
 0x72c   :  { %v1575_v3 = vmul.f32 0.03125, %v1571_v2 }
 0x72e   :  { %v1577_v4 = vadd.f32 1e-05, %v1575_v3 }
 0x72f   :  { %v1574_v5 = vpop.xlane.xlu0 %1573 }
 0x730   :  { %4741 = vrsqrt.f32 %v1577_v4  ;;  %v1576_v6 = vmul.f32 0.03125, %v1574_v5 }
 0x732   :  { %v1578_v7 = vadd.f32 1e-05, %v1576_v6 }
 0x734   :  { %4743 = vrsqrt.f32 %v1578_v7 }
 0x73a   :  { %v4742_v9 = vpop.eup %4741 }
 0x73b   :  { %v1581_v12 = vmul.f32 %v4742_v9, %v1565_v54 }
 0x73d   :  { %v1587_v15 = vmul.f32 %v4011_v10, %v1581_v12 }
 0x73e   :  { %v4744_v16 = vpop.eup %4743 }
 0x73f   :  { %v1582_v17 = vmul.f32 %v4744_v16, %v1566_v53  ;;  %v5102_v18 = vadd.f32 %v4012_v13, %v1587_v15 }
 0x741   :  { %v1588_v19 = vmul.f32 %v4011_v10, %v1582_v17  ;;  %4333 = vmatprep.mubr.msk.f32.mxu1 %vm29_vm0, %v5102_v18 }
 0x743   :  { %v5106_v20 = vadd.f32 %v4012_v13, %v1588_v19 }
 0x745   :  { %4334 = vmatmul.mubr.msk.f32.vlgmr.msra.gmra.mrb[18].mxu1 %vm29_vm0, %v5106_v20 }
 0x818   :  { %v4335_v45 = vpop.f32.mrb[18].mxu1 }
 0x819   :  { %v1682_v46 = vadd.f32 %v4335_v45, %v4013_v44  ;;  %v1676_v47 = vpop.f32.mrb[19].mxu1  ;;  %v4019_v45 = vld [vmem:[%s5556_s2 + $0x18] ss:$0 sm:$0xff] }
 0x81a   :  { %v1677_v22 = vadd.f32 %v4013_v44, %v1676_v47 }
 0x81b   :  { %v1688_v23 = vmul.f32 0.044715, %v1682_v46  ;;  %v1686_v60 = vmul.f32 0.5, %v1682_v46 }
 0x81c   :  { %v1687_v48 = vmul.f32 0.044715, %v1677_v22  ;;  %v1685_v58 = vmul.f32 0.5, %v1677_v22 }
 0x81d   :  { %v1690_v49 = vmul.f32 %v1688_v23, %v1682_v46 }
 0x81e   :  { %v1689_v50 = vmul.f32 %v1687_v48, %v1677_v22 }
 0x81f   :  { %v1692_v51 = vmul.f32 %v1690_v49, %v1682_v46 }
 0x820   :  { %v1691_v52 = vmul.f32 %v1689_v50, %v1677_v22 }
 0x821   :  { %v1694_v53 = vadd.f32 %v1692_v51, %v1682_v46 }
 0x822   :  { %v1693_v54 = vadd.f32 %v1691_v52, %v1677_v22 }
 0x823   :  { %v1696_v55 = vmul.f32 0.7978846, %v1694_v53 }
 0x824   :  { %v1695_v56 = vmul.f32 0.7978846, %v1693_v54 }
 0x825   :  { %4745 = vtanh.f32 %v1696_v55 }
 0x826   :  { %4747 = vtanh.f32 %v1695_v56 }
 0x82f   :  { %v4746_v57 = vpop.eup %4745 }
 0x830   :  { %v4748_v11 = vpop.eup %4747  ;;  %v1700_v8 = vadd.f32 1.0, %v4746_v57 }
 0x831   :  { %v1699_v59 = vadd.f32 1.0, %v4748_v11 }
 0x832   :  { %v1702_v62 = vmul.f32 %v1700_v8, %v1686_v60 }
 0x833   :  { %v1701_v61 = vmul.f32 %v1699_v59, %v1685_v58 }
 0x835   :  { %4368 = vmatprep.mubr.f32.mxu0 %v1701_v61 }
 0x836   :  { %4369 = vmatmul.mubr.f32.vlgmr.msra.gmra.mrb[18].mxu0 %v1702_v62 }
 0x837   :  { %4414 = vmatprep.mubr.msk.f32.mxu0 %vm4812_vm1, %v4809_v14 }
 0x909   :  { %v4370_v0 = vpop.f32.mrb[18].mxu0 }
 0x90a   :  { %v1796_v1 = vadd.f32 %v4370_v0, %v4016_v63  ;;  %v1790_v2 = vpop.f32.mrb[19].mxu0 }
 0x90b   :  { %v1791_v3 = vadd.f32 %v4016_v63, %v1790_v2 }
 0x90c   :  { %v1800_v4 = vadd.f32 %v1796_v1, %v5106_v20 }
 0x90d   :  { %v1799_v5 = vadd.f32 %v1791_v3, %v5102_v18  ;;  %v1841_v18 = vld [vmem:[%s5554_s1 + $0xe0] sm:$0xff] }
 0x90e   :  { %v1806_v6 = vsel %vm29_vm0, %v1800_v4, 0.0  ;;  %v4612_v25 = vpack.c.bf16 %v1842_v24, %v1841_v18 }
 0x90f   :  { %1807 = vadd.xlane.f32.xlu0 %v1806_v6  ;;  %v1803_v7 = vsel %vm29_vm0, %v1799_v5, 0.0 }
 0x910   :  { %1804 = vadd.xlane.f32.xlu1 %v1803_v7  ;;  %4613 = vmatprep.subr.bf16.mxu1 %v4612_v25 }
 0x911   :  { %4615 = vmatpush3.bf16.msra.mxu1 %v4612_v25 }
 0x912   :  { %4617 = vmatprep.subr.bf16.mxu1 %v4616_v28 }
 0x915   :  { %4619 = vmatpush3.bf16.msra.mxu1 %v4616_v28 }
 0x916   :  { %4382 = vmatprep.subr.mxu1 %v4809_v14 }
 0x99c   :  { %v1808_v9 = vpop.xlane.xlu0 %1807 }
 0x99d   :  { %v1810_v10 = vmul.f32 0.03125, %v1808_v9  ;;  %v1805_v12 = vpop.xlane.xlu1 %1804 }
 0x99e   :  { %v1809_v13 = vmul.f32 0.03125, %v1805_v12 }
 0x99f   :  { %v1812_v15 = vsub.f32 %v1800_v4, %v1810_v10 }
 0x9a0   :  { %v1811_v16 = vsub.f32 %v1799_v5, %v1809_v13 }
 0x9a1   :  { %v1814_v17 = vmul.f32 %v1812_v15, %v1812_v15 }
 0x9a2   :  { %v1813_v19 = vmul.f32 %v1811_v16, %v1811_v16 }
 0x9a3   :  { %v1818_v21 = vsel %vm29_vm0, %v1814_v17, 0.0 }
 0x9a4   :  { %1819 = vadd.xlane.f32.xlu0 %v1818_v21  ;;  %v1815_v20 = vsel %vm29_vm0, %v1813_v19, 0.0 }
 0x9a5   :  { %1816 = vadd.xlane.f32.xlu1 %v1815_v20 }
 0xa31   :  { %v1820_v29 = vpop.xlane.xlu0 %1819 }
 0xa32   :  { %v1822_v30 = vmul.f32 0.03125, %v1820_v29  ;;  %v1817_v31 = vpop.xlane.xlu1 %1816 }
 0xa33   :  { %v1821_v32 = vmul.f32 0.03125, %v1817_v31 }
 0xa34   :  { %v1824_v33 = vadd.f32 1e-05, %v1822_v30 }
 0xa35   :  { %v1823_v34 = vadd.f32 1e-05, %v1821_v32 }
 0xa36   :  { %4749 = vrsqrt.f32 %v1824_v33 }
 0xa37   :  { %4751 = vrsqrt.f32 %v1823_v34 }
 0xa40   :  { %v4750_v35 = vpop.eup %4749 }
 0xa41   :  { %v4752_v37 = vpop.eup %4751  ;;  %v1828_v38 = vmul.f32 %v4750_v35, %v1812_v15 }
 0xa42   :  { %v1827_v39 = vmul.f32 %v4752_v37, %v1811_v16 }
 0xa43   :  { %v1834_v41 = vmul.f32 %v4017_v36, %v1828_v38 }
 0xa44   :  { %v1833_v42 = vmul.f32 %v4017_v36, %v1827_v39 }
 0xa45   :  { %v5188_v44 = vadd.f32 %v4018_v40, %v1834_v41 }
 0xa46   :  { %v5186_v43 = vadd.f32 %v4018_v40, %v1833_v42 }
 0xa48   :  { %4379 = vmatprep.mubr.msk.f32.mxu1 %vm29_vm0, %v5186_v43 }
 0xa49   :  { %4380 = vmatmul.mubr.msk.f32.vlgmr.msra.gmra.mrb[20].mxu1 %vm29_vm0, %v5188_v44 }
 0xa4a   :  { %4384 = vmatprep.mubr.msk.f32.mxu1 %vm4812_vm1, %v4809_v14 }
 0xb1c   :  { %v4381_v46 = vpop.f32.mrb[20].mxu1 }
 0xb1d   :  { %v5199_v47 = vadd.f32 %v4381_v46, %v4019_v45  ;;  %v1922_v22 = vpop.f32.mrb[21].mxu1 }
 0xb1e   :  { %v5201_v23 = vadd.f32 %v4019_v45, %v1922_v22 }
 0xb1f   :  { %1935 = vrot.lane.b32.xlu0 %v5199_v47, %s4811_s30 }
 0xb20   :  { %1933 = vrot.lane.b32.xlu1 %v5201_v23, %s4811_s30 }
 0xb23   :  { %1941 = vrot.lane.b32.xlu0 %v5201_v23, %s4813_s4 }
 0xb24   :  { %1937 = vrot.lane.b32.xlu1 %v5201_v23, %s4810_s0 }
 0xb27   :  { %1945 = vrot.lane.b32.xlu0 %v5201_v23, %s4814_s5 }
 0xb28   :  { %1939 = vrot.lane.b32.xlu1 %v5199_v47, %s4810_s0 }
 0xb2c   :  { %1943 = vrot.lane.b32.xlu1 %v5199_v47, %s4813_s4 }
 0xb30   :  { %2021 = vrot.lane.b32.xlu1 %v5199_v47, %s4814_s5 }
 0xb91   :  { %v5219_v48 = vpop.permute.xlu0 %1935 }
 0xb92   :  { %2173 = vrot.lane.b32.xlu1 %v5219_v48, %s4814_s5  ;;  %v5223_v49 = vpop.permute.xlu1 %1933 }
 0xb93   :  { %2097 = vrot.lane.b32.xlu0 %v5223_v49, %s4814_s5 }
 0xb95   :  { %v5227_v50 = vpop.permute.xlu0 %1941 }
 0xb96   :  { %v5229_v51 = vpop.permute.xlu1 %1937 }
 0xb97   :  { %2249 = vrot.lane.b32.xlu0 %v5229_v51, %s4814_s5 }
 0xb99   :  { %v1946_v52 = vpop.permute.xlu0 %1945 }
 0xb9a   :  { %4383 = vmatpush3.xpose.msk.msra.mxu1 %vm127_vm2, %v1946_v52  ;;  %v5234_v53 = vpop.permute.xlu1 %1939 }
 0xb9b   :  { %2401 = vrot.lane.b32.xlu0 %v5227_v50, %s4814_s5  ;;  %2325 = vrot.lane.b32.xlu1 %v5234_v53, %s4814_s5 }
 0xb9c   :  { %4387 = vmatprep.subr.mxu1 %v4809_v14 }
 0xb9d   :  { %4385 = vmatmul.mubr.msk.f32.vlgmr.msra.gmra.mrb[22].mxu1 %vm127_vm2, %v5201_v23 }
 0xb9e   :  { %v5243_v54 = vpop.permute.xlu1 %1943  ;;  %4389 = vmatprep.mubr.msk.f32.mxu1 %vm4812_vm1, %v4809_v14 }
 0xb9f   :  { %2477 = vrot.lane.b32.xlu1 %v5243_v54, %s4814_s5 }
 0xba2   :  { %v2022_v55 = vpop.permute.xlu1 %2021 }
 0xba3   :  { %4388 = vmatpush3.xpose.msk.msra.mxu1 %vm127_vm2, %v2022_v55 }
 0xba4   :  { %4392 = vmatprep.subr.mxu1 %v4809_v14 }
 0xba6   :  { %4390 = vmatmul.mubr.msk.f32.vlgmr.msra.gmra.mrb[24].mxu1 %vm127_vm2, %v5199_v47 }
 0xba7   :  { %4394 = vmatprep.mubr.msk.f32.mxu1 %vm4812_vm1, %v4809_v14 }
 0xc04   :  { %v2174_v57 = vpop.permute.xlu1 %2173 }
 0xc05   :  { %v2098_v56 = vpop.permute.xlu0 %2097 }
 0xc06   :  { %4393 = vmatpush3.xpose.msk.msra.mxu1 %vm127_vm2, %v2098_v56 }
 0xc07   :  { %4397 = vmatprep.subr.mxu1 %v4809_v14 }
 0xc09   :  { %v2250_v11 = vpop.permute.xlu0 %2249  ;;  %4395 = vmatmul.mubr.msk.f32.vlgmr.msra.gmra.mrb[26].mxu1 %vm127_vm2, %v5223_v49 }
 0xc0a   :  { %4398 = vmatpush3.xpose.msk.msra.mxu1 %vm127_vm2, %v2174_v57  ;;  %4399 = vmatprep.mubr.msk.f32.mxu1 %vm4812_vm1, %v4809_v14 }
 0xc0b   :  { %4402 = vmatprep.subr.mxu1 %v4809_v14 }
 0xc0d   :  { %v2402_v8 = vpop.permute.xlu0 %2401  ;;  %4400 = vmatmul.mubr.msk.f32.vlgmr.msra.gmra.mrb[28].mxu1 %vm127_vm2, %v5219_v48  ;;  %v2326_v58 = vpop.permute.xlu1 %2325 }
 0xc0e   :  { %4403 = vmatpush3.xpose.msk.msra.mxu1 %vm127_vm2, %v2250_v11  ;;  %4413 = vmatpush3.xpose.msk.msra.mxu0 %vm127_vm2, %v2402_v8 }
 0xc0f   :  { %4404 = vmatprep.mubr.msk.f32.mxu1 %vm4812_vm1, %v4809_v14  ;;  %4407 = vmatprep.subr.mxu1 %v4809_v14 }
 0xc10   :  { %4422 = vmatprep.subr.mxu0 %v4809_v14 }
 0xc11   :  { %4405 = vmatmul.mubr.msk.f32.vlgmr.msra.gmra.mrb[30].mxu1 %vm127_vm2, %v5229_v51  ;;  %4415 = vmatmul.mubr.msk.f32.vlgmr.msra.gmra.mrb[20].mxu0 %vm127_vm2, %v5227_v50  ;;  %v2478_v59 = vpop.permute.xlu1 %2477 }
 0xc12   :  { %4408 = vmatpush3.xpose.msk.msra.mxu1 %vm127_vm2, %v2326_v58  ;;  %4409 = vmatprep.mubr.msk.f32.mxu1 %vm4812_vm1, %v4809_v14 }
 0xc13   :  { %4417 = vmatprep.subr.mxu1 %v4809_v14  ;;  %4424 = vmatprep.mubr.msk.f32.mxu0 %vm4812_vm1, %v4809_v14 }
 0xc15   :  { %4410 = vmatmul.mubr.msk.f32.vlgmr.msra.gmra.mrb[32].mxu1 %vm127_vm2, %v5234_v53 }
 0xc16   :  { %4418 = vmatpush3.xpose.msk.msra.mxu1 %vm127_vm2, %v2478_v59  ;;  %4419 = vmatprep.mubr.msk.f32.mxu1 %vm4812_vm1, %v4809_v14 }
 0xc17   :  { %4427 = vmatprep.subr.mxu1 %v4809_v14 }
 0xc19   :  { %4420 = vmatmul.mubr.msk.f32.vlgmr.msra.gmra.mrb[34].mxu1 %vm127_vm2, %v5243_v54 }
 0xc1a   :  { %4429 = vmatprep.mubr.msk.f32.mxu1 %vm4812_vm1, %v4809_v14 }
 0xc70   :  { %v2017_v60 = vpop.f32.mrb[22].mxu1 }
 0xc71   :  { %v4386_v61 = vpop.f32.mrb[23].mxu1  ;;  %v2553_v62 = vsel %vm127_vm2, %v2017_v60, -inf }
 0xc72   :  { %2554 = vmax.xlane.f32.xlu0 %v2553_v62 }
 0xc79   :  { %v2093_v63 = vpop.f32.mrb[24].mxu1 }
 0xc7a   :  { %v4391_v0 = vpop.f32.mrb[25].mxu1  ;;  %v2556_v1 = vsel %vm127_vm2, %v2093_v63, -inf }
 0xc7b   :  { %2557 = vmax.xlane.f32.xlu1 %v2556_v1 }
 0xcdc   :  { %v2169_v2 = vpop.f32.mrb[26].mxu1 }
 0xcdd   :  { %v4396_v3 = vpop.f32.mrb[27].mxu1  ;;  %v2559_v4 = vsel %vm127_vm2, %v2169_v2, -inf }
 0xcde   :  { %2560 = vmax.xlane.f32.xlu0 %v2559_v4 }
 0xce0   :  { %v2245_v5 = vpop.f32.mrb[28].mxu1 }
 0xce1   :  { %v4401_v6 = vpop.f32.mrb[29].mxu1  ;;  %v2562_v7 = vsel %vm127_vm2, %v2245_v5, -inf }
 0xce2   :  { %2563 = vmax.xlane.f32.xlu0 %v2562_v7 }
 0xce4   :  { %v2321_v9 = vpop.f32.mrb[30].mxu1  ;;  %v2473_v10 = vpop.f32.mrb[20].mxu0 }
 0xce5   :  { %v4406_v12 = vpop.f32.mrb[31].mxu1  ;;  %v4416_v13 = vpop.f32.mrb[21].mxu0  ;;  %v2565_v15 = vsel %vm127_vm2, %v2321_v9, -inf  ;;  %v2571_v19 = vsel %vm127_vm2, %v2473_v10, -inf }
 0xce6   :  { %2566 = vmax.xlane.f32.xlu1 %v2565_v15 }
 0xce8   :  { %v2397_v16 = vpop.f32.mrb[32].mxu1 }
 0xce9   :  { %v4411_v17 = vpop.f32.mrb[33].mxu1  ;;  %v2568_v21 = vsel %vm127_vm2, %v2397_v16, -inf }
 0xcea   :  { %2572 = vmax.xlane.f32.xlu1 %v2571_v19  ;;  %2569 = vmax.xlane.f32.xlu0 %v2568_v21 }
 0xcec   :  { %v2549_v20 = vpop.f32.mrb[34].mxu1 }
 0xced   :  { %v4421_v18 = vpop.f32.mrb[35].mxu1  ;;  %v2574_v24 = vsel %vm127_vm2, %v2549_v20, -inf }
 0xcee   :  { %2575 = vmax.xlane.f32.xlu0 %v2574_v24 }
 0xcfb   :  { %2641 = vrot.lane.b32.xlu1 %v5201_v23, %s4815_s6 }
 0xcff   :  { %2793 = vrot.lane.b32.xlu1 %v5223_v49, %s4815_s6  ;;  %v2555_v27 = vpop.xlane.xlu0 %2554 }
 0xd00   :  { %v2577_v28 = vsub.f32 %v2017_v60, %v2555_v27 }
 0xd02   :  { %v2585_v30 = vmul.f32 1.442695, %v2577_v28 }
 0xd03   :  { %2869 = vrot.lane.b32.xlu1 %v5219_v48, %s4815_s6 }
 0xd04   :  { %2717 = vrot.lane.b32.xlu0 %v5199_v47, %s4815_s6 }
 0xd07   :  { %3021 = vrot.lane.b32.xlu1 %v5234_v53, %s4815_s6 }
 0xd08   :  { %2945 = vrot.lane.b32.xlu0 %v5229_v51, %s4815_s6  ;;  %v2558_v25 = vpop.xlane.xlu1 %2557 }
 0xd09   :  { %v2578_v26 = vsub.f32 %v2093_v63, %v2558_v25 }
 0xd0b   :  { %v2587_v29 = vmul.f32 1.442695, %v2578_v26 }
 0xd0d   :  { %4753 = vpow2.f32 %v2587_v29 }
 0xd0e   :  { %4755 = vpow2.f32 %v2585_v30 }
 0xd17   :  { %v5311_v31 = vpop.eup %4753 }
 0xd18   :  { %v2604_v32 = vsel %vm127_vm2, %v5311_v31, 0.0  ;;  %v5315_v33 = vpop.eup %4755 }
 0xd19   :  { %v2601_v34 = vsel %vm127_vm2, %v5315_v33, 0.0 }
 0xd27   :  { %2605 = vadd.xlane.f32.xlu0 %v2604_v32 }
 0xd2b   :  { %2602 = vadd.xlane.f32.xlu1 %v2601_v34 }
 0xd6b   :  { %v2561_v35 = vpop.xlane.xlu0 %2560 }
 0xd6c   :  { %v2579_v36 = vsub.f32 %v2169_v2, %v2561_v35 }
 0xd6e   :  { %v2589_v37 = vmul.f32 1.442695, %v2579_v36 }
 0xd6f   :  { %v2564_v38 = vpop.xlane.xlu0 %2563 }
 0xd70   :  { %4757 = vpow2.f32 %v2589_v37  ;;  %v2580_v39 = vsub.f32 %v2245_v5, %v2564_v38 }
 0xd72   :  { %v2591_v40 = vmul.f32 1.442695, %v2580_v39 }
 0xd73   :  { %v2567_v41 = vpop.xlane.xlu1 %2566 }
 0xd74   :  { %4759 = vpow2.f32 %v2591_v40  ;;  %v2581_v42 = vsub.f32 %v2321_v9, %v2567_v41  ;;  %v3279_v41 = vld [vmem:[%s5554_s1 + $0x100] sm:$0xff] }
 0xd76   :  { %v2593_v51 = vmul.f32 1.442695, %v2581_v42  ;;  %v3280_v42 = vld [vmem:[%s5554_s1 + $0x108] sm:$0xff] }
 0xd77   :  { %v2570_v45 = vpop.xlane.xlu0 %2569  ;;  %v2573_v46 = vpop.xlane.xlu1 %2572 }
 0xd78   :  { %v2582_v47 = vsub.f32 %v2397_v16, %v2570_v45  ;;  %v2583_v22 = vsub.f32 %v2473_v10, %v2573_v46  ;;  %v4620_v45 = vpack.c.bf16 %v3280_v42, %v3279_v41  ;;  %v4049_v41 = vld [vmem:[%s5556_s2 + $0x1c] ss:$0 sm:$0xff] }
 0xd7a   :  { %v4758_v23 = vpop.eup %4757  ;;  %v2595_v48 = vmul.f32 1.442695, %v2582_v47  ;;  %v2597_v49 = vmul.f32 1.442695, %v2583_v22  ;;  %v3281_v22 = vld [vmem:[%s5554_s1 + $0x110] sm:$0xff] }
 0xd7b   :  { %v2576_v52 = vpop.xlane.xlu0 %2575  ;;  %v2642_v53 = vpop.permute.xlu1 %2641  ;;  %v2607_v55 = vsel %vm127_vm2, %v4758_v23, 0.0 }
 0xd7c   :  { %4761 = vpow2.f32 %v2595_v48  ;;  %v2584_v56 = vsub.f32 %v2549_v20, %v2576_v52  ;;  %2608 = vadd.xlane.f32.xlu1 %v2607_v55  ;;  %4423 = vmatpush3.msra.mxu0 %v2642_v53 }
 0xd7d   :  { %4763 = vpow2.f32 %v2597_v49  ;;  %4432 = vmatprep.subr.mxu0 %v4809_v14 }
 0xd7e   :  { %v4760_v57 = vpop.eup %4759  ;;  %v2599_v11 = vmul.f32 1.442695, %v2584_v56  ;;  %4765 = vpow2.f32 %v2593_v51 }
 0xd7f   :  { %v2718_v8 = vpop.permute.xlu0 %2717  ;;  %v2610_v58 = vsel %vm127_vm2, %v4760_v57, 0.0  ;;  %v2794_v3 = vpop.permute.xlu1 %2793 }
 0xd80   :  { %4767 = vpow2.f32 %v2599_v11  ;;  %4428 = vmatpush3.msra.mxu1 %v2718_v8  ;;  %2611 = vadd.xlane.f32.xlu0 %v2610_v58 }
 0xd81   :  { %4437 = vmatprep.subr.mxu1 %v4809_v14 }
 0xd83   :  { %v2870_v4 = vpop.permute.xlu1 %2869  ;;  %v2946_v5 = vpop.permute.xlu0 %2945 }
 0xd86   :  { %v4762_v59 = vpop.eup %4761 }
 0xd87   :  { %v5323_v60 = vpop.eup %4763  ;;  %v2616_v61 = vsel %vm127_vm2, %v4762_v59, 0.0  ;;  %v3022_v6 = vpop.permute.xlu1 %3021 }
 0xd88   :  { %2617 = vadd.xlane.f32.xlu0 %v2616_v61  ;;  %v2619_v62 = vsel %vm127_vm2, %v5323_v60, 0.0  ;;  %v4766_v63 = vpop.eup %4765 }
 0xd89   :  { %2620 = vadd.xlane.f32.xlu1 %v2619_v62  ;;  %v2613_v2 = vsel %vm127_vm2, %v4766_v63, 0.0 }
 0xd8a   :  { %v4768_v0 = vpop.eup %4767 }
 0xd8b   :  { %v2622_v1 = vsel %vm127_vm2, %v4768_v0, 0.0 }
 0xd8c   :  { %2623 = vadd.xlane.f32.xlu0 %v2622_v1 }
 0xd8d   :  { %2614 = vadd.xlane.f32.xlu1 %v2613_v2 }
 0xd9e   :  { %3173 = vrot.lane.b32.xlu1 %v5243_v54, %s4815_s6 }
 0xda2   :  { %3097 = vrot.lane.b32.xlu0 %v5227_v50, %s4815_s6 }
 0xdb4   :  { %v2606_v7 = vpop.xlane.xlu0 %2605 }
 0xdb5   :  { %4769 = vrcp.f32 %v2606_v7 }
 0xdb8   :  { %v2603_v9 = vpop.xlane.xlu1 %2602 }
 0xdb9   :  { %4771 = vrcp.f32 %v2603_v9 }
 0xdbf   :  { %v4770_v10 = vpop.eup %4769 }
 0xdc0   :  { %v2628_v12 = vmul.f32 %v4770_v10, %v5311_v31 }
 0xdc2   :  { %4430 = vmatmul.mubr.msk.f32.vlgmr.msra.gmra.mrb[36].mxu1 %vm127_vm2, %v2628_v12 }
 0xdc3   :  { %v4772_v13 = vpop.eup %4771  ;;  %4438 = vmatpush3.msra.mxu1 %v2870_v4  ;;  %4439 = vmatprep.mubr.msk.f32.mxu1 %vm4812_vm1, %v4809_v14 }
 0xdc4   :  { %v2626_v50 = vmul.f32 %v4772_v13, %v5315_v33  ;;  %4447 = vmatprep.subr.mxu1 %v4809_v14 }
 0xdc6   :  { %4425 = vmatmul.mubr.msk.f32.vlgmr.msra.gmra.mrb[22].mxu0 %vm127_vm2, %v2626_v50 }
 0xdc7   :  { %4433 = vmatpush3.msra.mxu0 %v2794_v3  ;;  %4434 = vmatprep.mubr.msk.f32.mxu0 %vm4812_vm1, %v4809_v14 }
 0xdc8   :  { %4442 = vmatprep.subr.mxu0 %v4809_v14 }
 0xe09   :  { %v2609_v54 = vpop.xlane.xlu1 %2608 }
 0xe0a   :  { %4773 = vrcp.f32 %v2609_v54 }
 0xe0d   :  { %v2612_v15 = vpop.xlane.xlu0 %2611 }
 0xe0e   :  { %4775 = vrcp.f32 %v2612_v15 }
 0xe14   :  { %v4774_v16 = vpop.eup %4773 }
 0xe15   :  { %v2630_v17 = vmul.f32 %v4774_v16, %v4758_v23  ;;  %v2618_v19 = vpop.xlane.xlu0 %2617  ;;  %v3282_v23 = vld [vmem:[%s5554_s1 + $0x118] sm:$0xff] }
 0xe16   :  { %4777 = vrcp.f32 %v2618_v19  ;;  %v2621_v21 = vpop.xlane.xlu1 %2620  ;;  %v4624_v48 = vpack.c.bf16 %v3282_v23, %v3281_v22 }
 0xe17   :  { %4435 = vmatmul.mubr.msk.f32.vlgmr.msra.gmra.mrb[24].mxu0 %vm127_vm2, %v2630_v17 }
 0xe18   :  { %v4776_v20 = vpop.eup %4775  ;;  %4443 = vmatpush3.msra.mxu0 %v2946_v5  ;;  %4444 = vmatprep.mubr.msk.f32.mxu0 %vm4812_vm1, %v4809_v14  ;;  %v4046_v5 = vld [vmem:[%s5556_s2 + $0x19] ss:$0 sm:$0xff] }
 0xe19   :  { %v2632_v18 = vmul.f32 %v4776_v20, %v4760_v57  ;;  %v2624_v24 = vpop.xlane.xlu0 %2623  ;;  %4452 = vmatprep.subr.mxu0 %v4809_v14 }
 0xe1a   :  { %4779 = vrcp.f32 %v2624_v24  ;;  %v2615_v25 = vpop.xlane.xlu1 %2614 }
 0xe1b   :  { %4781 = vrcp.f32 %v2615_v25  ;;  %4440 = vmatmul.mubr.msk.f32.vlgmr.msra.gmra.mrb[38].mxu1 %vm127_vm2, %v2632_v18 }
 0xe1c   :  { %4448 = vmatpush3.msra.mxu1 %v3022_v6  ;;  %4449 = vmatprep.mubr.msk.f32.mxu1 %vm4812_vm1, %v4809_v14  ;;  %4783 = vrcp.f32 %v2621_v21 }
 0xe1d   :  { %4457 = vmatprep.subr.mxu1 %v4809_v14  ;;  %v3098_v34 = vpop.permute.xlu0 %3097 }
 0xe1e   :  { %v3174_v28 = vpop.permute.xlu1 %3173 }
 0xe20   :  { %v4778_v26 = vpop.eup %4777 }
 0xe21   :  { %v2636_v27 = vmul.f32 %v4778_v26, %v4762_v59  ;;  %v3412_v26 = vld [vmem:[%s5554_s1 + $0x128] sm:$0xff] }
 0xe23   :  { %4450 = vmatmul.mubr.msk.f32.vlgmr.msra.gmra.mrb[40].mxu1 %vm127_vm2, %v2636_v27 }
 0xe24   :  { %v4780_v29 = vpop.eup %4779  ;;  %4458 = vmatpush3.msra.mxu1 %v3174_v28  ;;  %4459 = vmatprep.mubr.msk.f32.mxu1 %vm4812_vm1, %v4809_v14  ;;  %v3413_v28 = vld [vmem:[%s5554_s1 + $0x130] sm:$0xff] }
 0xe25   :  { %v4782_v30 = vpop.eup %4781  ;;  %v2640_v31 = vmul.f32 %v4780_v29, %v4768_v0  ;;  %v3414_v29 = vld [vmem:[%s5554_s1 + $0x138] sm:$0xff] }
 0xe26   :  { %v2634_v32 = vmul.f32 %v4782_v30, %v4766_v63  ;;  %v4784_v33 = vpop.eup %4783  ;;  %v4632_v30 = vpack.c.bf16 %v3414_v29, %v3413_v28 }
 0xe27   :  { %4460 = vmatmul.mubr.msk.f32.vlgmr.msra.gmra.mrb[42].mxu1 %vm127_vm2, %v2640_v31  ;;  %v2638_v35 = vmul.f32 %v4784_v33, %v5323_v60  ;;  %v3519_v31 = vld [vmem:[%s5554_s1 + $0x140] sm:$0xff] }
 0xe28   :  { %4445 = vmatmul.mubr.msk.f32.vlgmr.msra.gmra.mrb[26].mxu0 %vm127_vm2, %v2634_v32  ;;  %v3520_v32 = vld [vmem:[%s5554_s1 + $0x148] sm:$0xff] }
 0xe29   :  { %4453 = vmatpush3.msra.mxu0 %v3098_v34  ;;  %4454 = vmatprep.mubr.msk.f32.mxu0 %vm4812_vm1, %v4809_v14  ;;  %v4636_v33 = vpack.c.bf16 %v3520_v32, %v3519_v31 }
 0xe2a   :  { %4621 = vmatprep.subr.bf16.mxu0 %v4620_v45 }
 0xe2c   :  { %4455 = vmatmul.mubr.msk.f32.vlgmr.msra.gmra.mrb[28].mxu0 %vm127_vm2, %v2638_v35 }
 0xe2d   :  { %4623 = vmatpush3.bf16.msra.mxu0 %v4620_v45 }
 0xe2e   :  { %4625 = vmatprep.subr.bf16.mxu0 %v4624_v48 }
 0xe31   :  { %4627 = vmatpush3.bf16.msra.mxu0 %v4624_v48 }
 0xe32   :  { %4637 = vmatprep.subr.bf16.mxu0 %v4636_v33 }
 0xe95   :  { %v2789_v36 = vpop.f32.mrb[36].mxu1 }
 0xe96   :  { %v4431_v37 = vpop.f32.mrb[37].mxu1 }
 0xe99   :  { %v2713_v38 = vpop.f32.mrb[22].mxu0 }
 0xe9a   :  { %v4426_v39 = vpop.f32.mrb[23].mxu0 }
 0xeea   :  { %v2865_v40 = vpop.f32.mrb[24].mxu0 }
 0xeeb   :  { %3251 = vrot.lane.b32.xlu0 %v2865_v40, %s4816_s15  ;;  %v4436_v14 = vpop.f32.mrb[25].mxu0 }
 0xeec   :  { %v4050_v14 = vld [vmem:[%s5556_s2 + $0x1d] ss:$0 sm:$0xff] }
 0xeee   :  { %v2941_v46 = vpop.f32.mrb[38].mxu1 }
 0xeef   :  { %3253 = vrot.lane.b32.xlu1 %v2941_v46, %s4816_s15  ;;  %v4441_v47 = vpop.f32.mrb[39].mxu1 }
 0xef6   :  { %v3093_v49 = vpop.f32.mrb[40].mxu1 }
 0xef7   :  { %3261 = vrot.lane.b32.xlu1 %v3093_v49, %s4817_s16  ;;  %v4451_v51 = vpop.f32.mrb[41].mxu1  ;;  %v3521_v49 = vld [vmem:[%s5554_s1 + $0x150] sm:$0xff] }
 0xef8   :  { %v3522_v51 = vld [vmem:[%s5554_s1 + $0x158] sm:$0xff] }
 0xefa   :  { %v3245_v52 = vpop.f32.mrb[42].mxu1 }
 0xefb   :  { %v3017_v53 = vpop.f32.mrb[26].mxu0  ;;  %3269 = vrot.lane.b32.xlu1 %v3245_v52, %s4818_s17  ;;  %v4461_v55 = vpop.f32.mrb[43].mxu1  ;;  %v4640_v52 = vpack.c.bf16 %v3522_v51, %v3521_v49  ;;  %v3671_v49 = vld [vmem:[%s5554_s1 + $0x1e8] sm:$0xff]  ;;  %v3672_v51 = vld [vmem:[%s5554_s1 + $0x1f0] sm:$0xff] }
 0xefc   :  { %3259 = vrot.lane.b32.xlu0 %v3017_v53, %s4817_s16  ;;  %v4446_v56 = vpop.f32.mrb[27].mxu0  ;;  %v3523_v53 = vld [vmem:[%s5554_s1 + $0x160] sm:$0xff]  ;;  %v3524_v55 = vld [vmem:[%s5554_s1 + $0x168] sm:$0xff] }
 0xefd   :  { %v4644_v56 = vpack.c.bf16 %v3524_v55, %v3523_v53  ;;  %v3673_v53 = vld [vmem:[%s5554_s1 + $0x1f8] sm:$0xff] }
 0xefe   :  { %v4672_v55 = vpack.c.bf16 %v3673_v53, %v3672_v51  ;;  %v4062_v51 = vld [vmem:[%s5556_s2 + $0x21] ss:$0 sm:$0xff] }
 0xeff   :  { %v3169_v57 = vpop.f32.mrb[28].mxu0 }
 0xf00   :  { %3267 = vrot.lane.b32.xlu0 %v3169_v57, %s4818_s17  ;;  %v4456_v11 = vpop.f32.mrb[29].mxu0  ;;  %v3525_v57 = vld [vmem:[%s5554_s1 + $0x170] sm:$0xff] }
 0xf01   :  { %v3526_v11 = vld [vmem:[%s5554_s1 + $0x178] sm:$0xff] }
 0xf5d   :  { %v3252_v58 = vpop.permute.xlu0 %3251 }
 0xf5e   :  { %v3273_v61 = vsel %vm127_vm2, %v2713_v38, %v3252_v58  ;;  %v3527_v58 = vld [vmem:[%s5554_s1 + $0x180] sm:$0xff] }
 0xf61   :  { %v3254_v8 = vpop.permute.xlu1 %3253 }
 0xf62   :  { %v3274_v63 = vsel %vm127_vm2, %v2789_v36, %v3254_v8  ;;  %v4648_v8 = vpack.c.bf16 %v3526_v11, %v3525_v57  ;;  %v3667_v57 = vld [vmem:[%s5554_s1 + $0x1c8] sm:$0xff] }
 0xf69   :  { %v3262_v59 = vpop.permute.xlu1 %3261 }
 0xf6a   :  { %v3276_v2 = vsel %vm1456_vm3, %v3274_v63, %v3262_v59  ;;  %v3528_v59 = vld [vmem:[%s5554_s1 + $0x188] sm:$0xff] }
 0xf6d   :  { %v3270_v62 = vpop.permute.xlu1 %3269 }
 0xf6e   :  { %v3260_v60 = vpop.permute.xlu0 %3259  ;;  %v3278_v4 = vsel %vm1459_vm4, %v3276_v2, %v3270_v62  ;;  %v3530_v62 = vld [vmem:[%s5554_s1 + $0x198] sm:$0xff] }
 0xf6f   :  { %v3275_v0 = vsel %vm1456_vm3, %v3273_v61, %v3260_v60  ;;  %v4652_v60 = vpack.c.bf16 %v3528_v59, %v3527_v58  ;;  %v3529_v61 = vld [vmem:[%s5554_s1 + $0x190] sm:$0xff] }
 0xf70   :  { %v4656_v63 = vpack.c.bf16 %v3530_v62, %v3529_v61 }
 0xf72   :  { %v3268_v1 = vpop.permute.xlu0 %3267 }
 0xf73   :  { %v3277_v3 = vsel %vm1459_vm4, %v3275_v0, %v3268_v1  ;;  %v3531_v0 = vld [vmem:[%s5554_s1 + $0x1a0] sm:$0xff]  ;;  %v3532_v1 = vld [vmem:[%s5554_s1 + $0x1a8] sm:$0xff] }
 0xf74   :  { %4470 = vmatprep.mubr.msk.f32.mxu0 %vm29_vm0, %v3277_v3  ;;  %v4660_v2 = vpack.c.bf16 %v3532_v1, %v3531_v0  ;;  %v3533_v3 = vld [vmem:[%s5554_s1 + $0x1b0] sm:$0xff]  ;;  %v4055_v1 = vld [vmem:[%s5556_s2 + $0x1e] ss:$0 sm:$0xff] }
 0xf75   :  { %4471 = vmatmul.mubr.msk.f32.vlgmr.msra.gmra.mrb[30].mxu0 %vm29_vm0, %v3278_v4  ;;  %v3534_v4 = vld [vmem:[%s5554_s1 + $0x1b8] sm:$0xff] }
 0xf76   :  { %4639 = vmatpush3.bf16.msra.mxu0 %v4636_v33 }
 0xf77   :  { %4641 = vmatprep.subr.bf16.mxu0 %v4640_v52 }
 0xf7a   :  { %4643 = vmatpush3.bf16.msra.mxu0 %v4640_v52 }
 0xf7b   :  { %4645 = vmatprep.subr.bf16.mxu0 %v4644_v56 }
 0xf7e   :  { %4647 = vmatpush3.bf16.msra.mxu0 %v4644_v56  ;;  %v3666_v56 = vld [vmem:[%s5554_s1 + $0x1c0] sm:$0xff] }
 0xf7f   :  { %4649 = vmatprep.subr.bf16.mxu0 %v4648_v8  ;;  %v4676_v11 = vpack.c.bf16 %v3667_v57, %v3666_v56 }
 0xf82   :  { %4651 = vmatpush3.bf16.msra.mxu0 %v4648_v8 }
 0xf83   :  { %4653 = vmatprep.subr.bf16.mxu0 %v4652_v60 }
 0xf86   :  { %4655 = vmatpush3.bf16.msra.mxu0 %v4652_v60 }
 0xf87   :  { %4657 = vmatprep.subr.bf16.mxu0 %v4656_v63 }
 0xf8a   :  { %4659 = vmatpush3.bf16.msra.mxu0 %v4656_v63  ;;  %v3661_v63 = vlaneseq }
 0xf8b   :  { %4661 = vmatprep.subr.bf16.mxu0 %v4660_v2 }
 0xf8e   :  { %4663 = vmatpush3.bf16.msra.mxu0 %v4660_v2 }
0x1048   :  { %v4472_v6 = vpop.f32.mrb[30].mxu0 }
0x1049   :  { %v3366_v7 = vadd.f32 %v4472_v6, %v4046_v5  ;;  %v3360_v9 = vpop.f32.mrb[31].mxu0  ;;  %v4051_v6 = vld [vmem:[%s5556_s2 + $0x1a] ss:$0 sm:$0xff] }
0x104a   :  { %v3361_v10 = vadd.f32 %v4046_v5, %v3360_v9  ;;  %v4664_v5 = vpack.c.bf16 %v3534_v4, %v3533_v3 }
0x104b   :  { %v3370_v12 = vadd.f32 %v3366_v7, %v5188_v44 }
0x104c   :  { %v3369_v13 = vadd.f32 %v3361_v10, %v5186_v43  ;;  %v3411_v43 = vld [vmem:[%s5554_s1 + $0x120] sm:$0xff]  ;;  %4665 = vmatprep.subr.bf16.mxu0 %v4664_v5 }
0x104d   :  { %v3376_v50 = vsel %vm29_vm0, %v3370_v12, 0.0  ;;  %v4628_v27 = vpack.c.bf16 %v3412_v26, %v3411_v43  ;;  %4667 = vmatpush3.bf16.msra.mxu0 %v4664_v5  ;;  %v4056_v5 = vld [vmem:[%s5556_s2 + $0x1f] ss:$0 sm:$0xff] }
0x104e   :  { %3377 = vadd.xlane.f32.xlu1 %v3376_v50  ;;  %v3373_v54 = vsel %vm29_vm0, %v3369_v13, 0.0 }
0x104f   :  { %3374 = vadd.xlane.f32.xlu0 %v3373_v54  ;;  %4629 = vmatprep.subr.bf16.mxu1 %v4628_v27 }
0x1050   :  { %4631 = vmatpush3.bf16.msra.mxu1 %v4628_v27 }
0x1051   :  { %4633 = vmatprep.subr.bf16.mxu1 %v4632_v30 }
0x1054   :  { %4635 = vmatpush3.bf16.msra.mxu1 %v4632_v30  ;;  %v4054_v30 = vld [vmem:[%s5556_s2 + $0x1b] ss:$0 sm:$0xff] }
0x10db   :  { %v3378_v15 = vpop.xlane.xlu1 %3377 }
0x10dc   :  { %v3380_v16 = vmul.f32 0.03125, %v3378_v15  ;;  %v3375_v17 = vpop.xlane.xlu0 %3374 }
0x10dd   :  { %v3379_v19 = vmul.f32 0.03125, %v3375_v17 }
0x10de   :  { %v3382_v21 = vsub.f32 %v3370_v12, %v3380_v16 }
0x10df   :  { %v3381_v20 = vsub.f32 %v3369_v13, %v3379_v19 }
0x10e0   :  { %v3384_v25 = vmul.f32 %v3382_v21, %v3382_v21 }
0x10e1   :  { %v3383_v18 = vmul.f32 %v3381_v20, %v3381_v20 }
0x10e2   :  { %v3388_v44 = vsel %vm29_vm0, %v3384_v25, 0.0 }
0x10e3   :  { %v3385_v24 = vsel %vm29_vm0, %v3383_v18, 0.0 }
0x10e4   :  { %3386 = vadd.xlane.f32.xlu0 %v3385_v24 }
0x10e8   :  { %3389 = vadd.xlane.f32.xlu0 %v3388_v44 }
0x1171   :  { %v3387_v34 = vpop.xlane.xlu0 %3386 }
0x1172   :  { %v3391_v35 = vmul.f32 0.03125, %v3387_v34 }
0x1174   :  { %v3393_v36 = vadd.f32 1e-05, %v3391_v35 }
0x1175   :  { %v3390_v37 = vpop.xlane.xlu0 %3389 }
0x1176   :  { %4785 = vrsqrt.f32 %v3393_v36  ;;  %v3392_v38 = vmul.f32 0.03125, %v3390_v37 }
0x1178   :  { %v3394_v39 = vadd.f32 1e-05, %v3392_v38 }
0x117a   :  { %4787 = vrsqrt.f32 %v3394_v39 }
0x1180   :  { %v4786_v40 = vpop.eup %4785 }
0x1181   :  { %v3397_v42 = vmul.f32 %v4786_v40, %v3381_v20 }
0x1183   :  { %v3403_v45 = vmul.f32 %v4049_v41, %v3397_v42 }
0x1184   :  { %v4788_v46 = vpop.eup %4787 }
0x1185   :  { %v3398_v47 = vmul.f32 %v4788_v46, %v3382_v21  ;;  %v5420_v22 = vadd.f32 %v4050_v14, %v3403_v45 }
0x1187   :  { %v3404_v23 = vmul.f32 %v4049_v41, %v3398_v47  ;;  %4481 = vmatprep.mubr.msk.f32.mxu1 %vm29_vm0, %v5420_v22 }
0x1189   :  { %v5424_v48 = vadd.f32 %v4050_v14, %v3404_v23 }
0x118b   :  { %4482 = vmatmul.mubr.msk.f32.vlgmr.msra.gmra.mrb[44].mxu1 %vm29_vm0, %v5424_v48 }
0x125e   :  { %v4483_v7 = vpop.f32.mrb[44].mxu1 }
0x125f   :  { %v3498_v9 = vadd.f32 %v4483_v7, %v4051_v6  ;;  %v3492_v10 = vpop.f32.mrb[45].mxu1  ;;  %v3662_v7 = vshrl.u32 %v3661_v63, 7 }
0x1260   :  { %v3493_v12 = vadd.f32 %v4051_v6, %v3492_v10 }
0x1261   :  { %v3504_v13 = vmul.f32 0.044715, %v3498_v9  ;;  %v3502_v27 = vmul.f32 0.5, %v3498_v9  ;;  %vm3663_vm5 = vcmp.lt.s32.totalorder %v3662_v7, 7 }
0x1262   :  { %v3503_v50 = vmul.f32 0.044715, %v3493_v12  ;;  %v3501_v43 = vmul.f32 0.5, %v3493_v12 }
0x1263   :  { %v3506_v54 = vmul.f32 %v3504_v13, %v3498_v9 }
0x1264   :  { %v3505_v15 = vmul.f32 %v3503_v50, %v3493_v12  ;;  %v3668_v50 = vld [vmem:[%s5554_s1 + $0x1d0] sm:$0xff] }
0x1265   :  { %v3508_v16 = vmul.f32 %v3506_v54, %v3498_v9  ;;  %v3669_v54 = vld [vmem:[%s5554_s1 + $0x1d8] sm:$0xff] }
0x1266   :  { %v3507_v17 = vmul.f32 %v3505_v15, %v3493_v12 }
0x1267   :  { %v3510_v19 = vadd.f32 %v3508_v16, %v3498_v9 }
0x1268   :  { %v3509_v21 = vadd.f32 %v3507_v17, %v3493_v12 }
0x1269   :  { %v3512_v20 = vmul.f32 0.7978846, %v3510_v19  ;;  %v4680_v19 = vpack.c.bf16 %v3669_v54, %v3668_v50 }
0x126a   :  { %v3511_v18 = vmul.f32 0.7978846, %v3509_v21  ;;  %v3861_v21 = vld [vmem:[%s5554_s1 + $0x200] sm:$0xff] }
0x126b   :  { %4789 = vtanh.f32 %v3512_v20  ;;  %v3862_v20 = vld [vmem:[%s5554_s1 + $0x208] sm:$0xff] }
0x126c   :  { %4791 = vtanh.f32 %v3511_v18  ;;  %v3863_v18 = vld [vmem:[%s5554_s1 + $0x210] sm:$0xff] }
0x1275   :  { %v4790_v24 = vpop.eup %4789 }
0x1276   :  { %v4792_v25 = vpop.eup %4791  ;;  %v3516_v44 = vadd.f32 1.0, %v4790_v24  ;;  %v4684_v24 = vpack.c.bf16 %v3862_v20, %v3861_v21 }
0x1277   :  { %v3515_v26 = vadd.f32 1.0, %v4792_v25  ;;  %v3864_v25 = vld [vmem:[%s5554_s1 + $0x218] sm:$0xff] }
0x1278   :  { %v3518_v29 = vmul.f32 %v3516_v44, %v3502_v27  ;;  %v4688_v44 = vpack.c.bf16 %v3864_v25, %v3863_v18 }
0x1279   :  { %v3517_v28 = vmul.f32 %v3515_v26, %v3501_v43  ;;  %v3865_v43 = vld [vmem:[%s5554_s1 + $0x220] sm:$0xff]  ;;  %v3866_v26 = vld [vmem:[%s5554_s1 + $0x228] sm:$0xff] }
0x127a   :  { %v4692_v27 = vpack.c.bf16 %v3866_v26, %v3865_v43 }
0x127b   :  { %4516 = vmatprep.mubr.f32.mxu0 %v3517_v28  ;;  %v4061_v28 = vld [vmem:[%s5556_s2 + $0x20] ss:$0 sm:$0xff] }
0x127c   :  { %4517 = vmatmul.mubr.f32.vlgmr.msra.gmra.mrb[32].mxu0 %v3518_v29 }
0x134f   :  { %v4518_v31 = vpop.f32.mrb[32].mxu0 }
0x1350   :  { %v3612_v32 = vadd.f32 %v4518_v31, %v4054_v30  ;;  %v3606_v33 = vpop.f32.mrb[33].mxu0 }
0x1351   :  { %v3607_v34 = vadd.f32 %v4054_v30, %v3606_v33 }
0x1352   :  { %v3616_v35 = vadd.f32 %v3612_v32, %v5424_v48 }
0x1353   :  { %v3615_v36 = vadd.f32 %v3607_v34, %v5420_v22  ;;  %v3670_v22 = vld [vmem:[%s5554_s1 + $0x1e0] sm:$0xff] }
0x1354   :  { %v3622_v37 = vsel %vm29_vm0, %v3616_v35, 0.0  ;;  %v4668_v52 = vpack.c.bf16 %v3671_v49, %v3670_v22 }
0x1355   :  { %3623 = vadd.xlane.f32.xlu0 %v3622_v37  ;;  %v3619_v38 = vsel %vm29_vm0, %v3615_v36, 0.0 }
0x1356   :  { %3620 = vadd.xlane.f32.xlu1 %v3619_v38  ;;  %4669 = vmatprep.subr.bf16.mxu1 %v4668_v52 }
0x1357   :  { %4671 = vmatpush3.bf16.msra.mxu1 %v4668_v52 }
0x1358   :  { %4673 = vmatprep.subr.bf16.mxu1 %v4672_v55 }
0x135b   :  { %4675 = vmatpush3.bf16.msra.mxu1 %v4672_v55 }
0x135c   :  { %4677 = vmatprep.subr.bf16.mxu1 %v4676_v11 }
0x13e2   :  { %v3624_v39 = vpop.xlane.xlu0 %3623 }
0x13e3   :  { %v3626_v40 = vmul.f32 0.03125, %v3624_v39  ;;  %v3621_v41 = vpop.xlane.xlu1 %3620 }
0x13e4   :  { %v3625_v42 = vmul.f32 0.03125, %v3621_v41 }
0x13e5   :  { %v3628_v14 = vsub.f32 %v3616_v35, %v3626_v40 }
0x13e6   :  { %v3627_v45 = vsub.f32 %v3615_v36, %v3625_v42 }
0x13e7   :  { %v3630_v46 = vmul.f32 %v3628_v14, %v3628_v14 }
0x13e8   :  { %v3629_v47 = vmul.f32 %v3627_v45, %v3627_v45 }
0x13e9   :  { %v3634_v23 = vsel %vm29_vm0, %v3630_v46, 0.0 }
0x13ea   :  { %3635 = vadd.xlane.f32.xlu0 %v3634_v23  ;;  %v3631_v48 = vsel %vm29_vm0, %v3629_v47, 0.0 }
0x13eb   :  { %3632 = vadd.xlane.f32.xlu1 %v3631_v48 }
0x1477   :  { %v3636_v8 = vpop.xlane.xlu0 %3635 }
0x1478   :  { %v3638_v58 = vmul.f32 0.03125, %v3636_v8  ;;  %v3633_v59 = vpop.xlane.xlu1 %3632 }
0x1479   :  { %v3637_v60 = vmul.f32 0.03125, %v3633_v59 }
0x147a   :  { %v3640_v61 = vadd.f32 1e-05, %v3638_v58 }
0x147b   :  { %v3639_v62 = vadd.f32 1e-05, %v3637_v60 }
0x147c   :  { %4793 = vrsqrt.f32 %v3640_v61 }
0x147d   :  { %4795 = vrsqrt.f32 %v3639_v62 }
0x1486   :  { %v4794_v0 = vpop.eup %4793 }
0x1487   :  { %v4796_v2 = vpop.eup %4795  ;;  %v3644_v3 = vmul.f32 %v4794_v0, %v3628_v14 }
0x1488   :  { %v3643_v4 = vmul.f32 %v4796_v2, %v3627_v45 }
0x1489   :  { %v3650_v6 = vmul.f32 %v4055_v1, %v3644_v3 }
0x148a   :  { %v3649_v9 = vmul.f32 %v4055_v1, %v3643_v4 }
0x148b   :  { %v3656_v10 = vadd.f32 %v4056_v5, %v3650_v6 }
0x148c   :  { %v3655_v12 = vadd.f32 %v4056_v5, %v3649_v9 }
0x148d   :  { %v3660_v13 = vrot.slane %v3656_v10, 1  ;;  %3658 = vst.msk [vmem:[%s5557_s3 + $0x8] sm:$0xff] %vm29_vm0, %v3656_v10 }
0x148e   :  { %v3659_v15 = vrot.slane %v3655_v12, 1  ;;  %3657 = vst.msk [vmem:[%s5557_s3] sm:$0xff] %vm29_vm0, %v3655_v12 }
0x1490   :  { %v3664_v16 = vsel %vm3663_vm5, %v3659_v15, %v3660_v13  ;;  %v3665_v17 = vsel %vm3663_vm5, %v3660_v13, %v3659_v15 }
0x1491   :  { %4527 = vmatprep.mubr.msk.f32.mxu1 %vm29_vm0, %v3664_v16 }
0x1492   :  { %4528 = vmatmul.mubr.msk.f32.vlgmr.msra.gmra.mrb[46].mxu1 %vm29_vm0, %v3665_v17 }
0x1493   :  { %4679 = vmatpush3.bf16.msra.mxu1 %v4676_v11  ;;  %4538 = vmatprep.mubr.msk.f32.mxu1 %vm29_vm0, %v3655_v12 }
0x1494   :  { %4681 = vmatprep.subr.bf16.mxu1 %v4680_v19 }
0x1497   :  { %4683 = vmatpush3.bf16.msra.mxu1 %v4680_v19 }
0x1498   :  { %4685 = vmatprep.subr.bf16.mxu1 %v4684_v24 }
0x149a   :  { %4539 = vmatmul.mubr.msk.f32.vlgmr.msra.gmra.mrb[46].mxu1 %vm29_vm0, %v3656_v10 }
0x149b   :  { %4687 = vmatpush3.bf16.msra.mxu1 %v4684_v24 }
0x149c   :  { %4689 = vmatprep.subr.bf16.mxu1 %v4688_v44 }
0x149f   :  { %4691 = vmatpush3.bf16.msra.mxu1 %v4688_v44 }
0x14a0   :  { %4693 = vmatprep.subr.bf16.mxu1 %v4692_v27 }
0x14a3   :  { %4695 = vmatpush3.bf16.msra.mxu1 %v4692_v27 }
0x156d   :  { %v4540_v29 = vpop.f32.mrb[46].mxu1 }
0x156e   :  { %v3842_v30 = vadd.f32 %v4540_v29, %v4061_v28  ;;  %v3827_v31 = vpop.f32.mrb[47].mxu1 }
0x156f   :  { %v3841_v32 = vadd.f32 %v4061_v28, %v3827_v31 }
0x1570   :  { %v3846_v33 = vmul.f32 0.044715, %v3842_v30  ;;  %v3844_v48 = vmul.f32 0.5, %v3842_v30 }
0x1571   :  { %v3845_v34 = vmul.f32 0.044715, %v3841_v32  ;;  %v3843_v47 = vmul.f32 0.5, %v3841_v32 }
0x1572   :  { %v3848_v35 = vmul.f32 %v3846_v33, %v3842_v30 }
0x1573   :  { %v3847_v36 = vmul.f32 %v3845_v34, %v3841_v32 }
0x1574   :  { %v3850_v37 = vmul.f32 %v3848_v35, %v3842_v30 }
0x1575   :  { %v3849_v38 = vmul.f32 %v3847_v36, %v3841_v32 }
0x1576   :  { %v3852_v39 = vadd.f32 %v3850_v37, %v3842_v30 }
0x1577   :  { %v3851_v40 = vadd.f32 %v3849_v38, %v3841_v32 }
0x1578   :  { %v3854_v41 = vmul.f32 0.7978846, %v3852_v39 }
0x1579   :  { %v3853_v42 = vmul.f32 0.7978846, %v3851_v40 }
0x157a   :  { %4797 = vtanh.f32 %v3854_v41 }
0x157b   :  { %4799 = vtanh.f32 %v3853_v42 }
0x1584   :  { %v4798_v14 = vpop.eup %4797 }
0x1585   :  { %v4800_v45 = vpop.eup %4799  ;;  %v3858_v46 = vadd.f32 1.0, %v4798_v14 }
0x1586   :  { %v3857_v23 = vadd.f32 1.0, %v4800_v45 }
0x1587   :  { %v3860_v49 = vmul.f32 %v3858_v46, %v3844_v48 }
0x1588   :  { %v3859_v22 = vmul.f32 %v3857_v23, %v3843_v47 }
0x158a   :  { %4553 = vmatprep.mubr.msk.f32.mxu1 %vm3872_vm6, %v3859_v22 }
0x158b   :  { %4554 = vmatmul.mubr.msk.f32.vlgmr.msra.gmra.mrb[48].mxu1 %vm3872_vm6, %v3860_v49 }
0x165e   :  { %v4555_v52 = vpop.f32.mrb[48].mxu1 }
0x165f   :  { %v3951_v53 = vadd.f32 %v4555_v52, %v4062_v51  ;;  %v3945_v55 = vpop.f32.mrb[49].mxu1 }
0x1660   :  { %v3946_v56 = vadd.f32 %v4062_v51, %v3945_v55 }
0x1661   :  { %v4066_v57 = vmul.f32 -1.442695, %v3951_v53 }
0x1662   :  { %v4065_v11 = vmul.f32 -1.442695, %v3946_v56 }
0x1663   :  { %4801 = vpow2.f32 %v4066_v57 }
0x1664   :  { %4803 = vpow2.f32 %v4065_v11 }
0x166d   :  { %v4802_v8 = vpop.eup %4801 }
0x166e   :  { %v4804_v58 = vpop.eup %4803  ;;  %v3961_v59 = vadd.f32 1.0, %v4802_v8 }
0x166f   :  { %v3960_v60 = vadd.f32 1.0, %v4804_v58 }
0x1670   :  { %4805 = vrcp.f32 %v3961_v59 }
0x1671   :  { %4807 = vrcp.f32 %v3960_v60 }
0x167a   :  { %v4806_v61 = vpop.eup %4805 }
0x167b   :  { %v4808_v62 = vpop.eup %4807  ;;  %3970 = vrot.lane.b32.xlu0 %v4806_v61, %s4819_s27 }
0x167c   :  { %3968 = vrot.lane.b32.xlu1 %v4808_v62, %s4819_s27 }
0x16ed   :  { %v3971_v63 = vpop.permute.xlu0 %3970 }
0x16ee   :  { %3976 = vst.msk [vmem:[%s5557_s3 + $0x8] sm:$0xff] %vm3974_vm7, %v3971_v63  ;;  %v3969_v0 = vpop.permute.xlu1 %3968 }
0x16ef   :  { %3975 = vst.msk [vmem:[%s5557_s3] sm:$0xff] %vm3974_vm7, %v3969_v0 }

</bundles_post_ra>
